<compile_context>
chip_gen: v7x
topology: tpu7x:2x2x1
jax: 0.10.0
libtpu: 0.0.40
codegen_flags: <defaults>
</compile_context>

<pallas_src>
import functools

import jax
import jax.numpy as jnp
from jax import lax
from jax.experimental import pallas as pl
from jax.experimental.pallas import tpu as pltpu


# ----------------------------------------------------------------------------
# Fused Pallas kernel (both hands + all layers + gather + FC)
# ----------------------------------------------------------------------------
def _make_lstm_hands_kernel(T, Bp, H, num_layers):
    """Build the fused kernel for static (T, Bp, H, num_layers)."""
    H2 = 2 * H        # combined hidden width   [left_h | right_h]
    G = 8 * H         # combined gate width:  4 gates x (left H | right H)

    def kernel(*refs):
        # inputs : x2d, lens, (wih, whh, b) per layer, fc_w_t, fc_b
        # outputs: out
        # scratch: proj_ref (T*Bp, G) f32, act_ref (T*Bp, 2H) f32
        x_ref = refs[0]                      # (T*Bp, 2*input_size) f32
        lens_ref = refs[1]                   # (Bp, 1) int32
        w_refs = refs[2:2 + 3 * num_layers]
        fcw_ref = refs[2 + 3 * num_layers]   # (2H, C)
        fcb_ref = refs[3 + 3 * num_layers]   # (1, C)
        out_ref = refs[4 + 3 * num_layers]   # (Bp, C)
        proj_ref = refs[5 + 3 * num_layers]  # (T*Bp, G) VMEM scratch
        act_ref = refs[6 + 3 * num_layers]   # (T*Bp, 2H) VMEM scratch

        last_t = lens_ref[...] - 1           # (Bp, 1) int32

        final_h = jnp.zeros((Bp, H2), jnp.float32)

        for layer in range(num_layers):
            wih_ref = w_refs[3 * layer]       # (Din, G)  pre-transposed
            whh_ref = w_refs[3 * layer + 1]   # (2H, G)   pre-transposed
            b_ref = w_refs[3 * layer + 2]     # (1, G)    b_ih + b_hh

            # Hoisted input projection for the whole sequence: one big matmul.
            inp = x_ref[...] if layer == 0 else act_ref[...]
            proj_ref[...] = (
                jnp.dot(inp, wih_ref[...], preferred_element_type=jnp.float32)
                + b_ref[...])

            h = jnp.zeros((Bp, H2), jnp.float32)
            c = jnp.zeros((Bp, H2), jnp.float32)
            is_last = layer == num_layers - 1

            # Serial recurrence: one (Bp, 2H) x (2H, 8H) matmul + gates / step.
            for t in range(T):
                gates = proj_ref[pl.ds(t * Bp, Bp), :] + jnp.dot(
                    h, whh_ref[...], preferred_element_type=jnp.float32)
                i_g = jax.nn.sigmoid(gates[:, 0 * H2:1 * H2])
                f_g = jax.nn.sigmoid(gates[:, 1 * H2:2 * H2])
                g_g = jnp.tanh(gates[:, 2 * H2:3 * H2])
                o_g = jax.nn.sigmoid(gates[:, 3 * H2:4 * H2])
                c = f_g * c + i_g * g_g
                h = o_g * jnp.tanh(c)
                if is_last:
                    # Capture the hidden state at the last *valid* step
                    # (pack_padded_sequence semantics), in-kernel.
                    final_h = jnp.where(last_t == t, h, final_h)
                else:
                    act_ref[pl.ds(t * Bp, Bp), :] = h

        # Final linear layer, in-kernel (avoids a separate tiny pallas_call).
        out = jnp.dot(final_h, fcw_ref[...],
                      preferred_element_type=jnp.float32) + fcb_ref[...]
        out_ref[...] = out.astype(out_ref.dtype)

    return kernel


# ----------------------------------------------------------------------------
# Host-side weight packing (per-hand PyTorch layout -> fused kernel layout)
# ----------------------------------------------------------------------------
def pack_params(params):
    """Pack left/right per-gate weights into block-diagonal fused matrices.

    Combined layout: hidden = [left_h | right_h] (width 2H); gates are
    gate-major / hand-minor, i.e. gate k occupies columns [k*2H, (k+1)*2H)
    with the left hand in the first H columns and the right hand in the last.
    """
    left, right = params["left"], params["right"]
    H = left[0][1].shape[-1]
    H2, G = 2 * H, 8 * H

    layers = []
    for (wihL, whhL, bL), (wihR, whhR, bR) in zip(left, right):
        Din = wihL.shape[-1]
        wih = jnp.zeros((2 * Din, G), jnp.float32)
        whh = jnp.zeros((H2, G), jnp.float32)
        b = jnp.zeros((1, G), jnp.float32)
        for k in range(4):                      # PyTorch gate order i, f, g, o
            lo, mid, hi = k * H2, k * H2 + H, (k + 1) * H2
            wih = wih.at[:Din, lo:mid].set(wihL[k].T)   # left features -> left
            wih = wih.at[Din:, mid:hi].set(wihR[k].T)   # right features -> right
            whh = whh.at[:H, lo:mid].set(whhL[k].T)
            whh = whh.at[H:, mid:hi].set(whhR[k].T)
            b = b.at[0, lo:mid].set(bL[k, 0])
            b = b.at[0, mid:hi].set(bR[k, 0])
        layers.append((wih, whh, b))

    return {
        "layers": tuple(layers),
        "fc_w_t": params["fc_w"].T.astype(jnp.float32),   # (2H, C)
        "fc_b": params["fc_b"].astype(jnp.float32),        # (1, C)
    }


# ----------------------------------------------------------------------------
# Forward wrapper
# ----------------------------------------------------------------------------
@jax.jit
def lstm_per_hand_forward(seq_batch_coords, seq_lengths, packed):
    """Forward pass of LSTM_per_hand (eval mode) using one fused Pallas call."""
    T, B, F2 = seq_batch_coords.shape
    layers = packed["layers"]
    num_layers = len(layers)
    H2 = layers[0][1].shape[0]
    H = H2 // 2
    C = packed["fc_w_t"].shape[-1]

    # Pad batch to the f32 sublane height so all in-kernel row slices align.
    Bp = max(8, ((B + 7) // 8) * 8)
    x = seq_batch_coords.astype(jnp.float32)
    x = jnp.pad(x, ((0, 0), (0, Bp - B), (0, 0)))
    x2d = x.reshape(T * Bp, F2)                      # time-major rows, no copy
    lens = jnp.pad(seq_lengths.astype(jnp.int32), (0, Bp - B),
                   constant_values=1).reshape(Bp, 1)

    kernel = _make_lstm_hands_kernel(T, Bp, H, num_layers)
    flat_w = [w for layer in layers for w in layer]

    out = pl.pallas_call(
        kernel,
        out_shape=jax.ShapeDtypeStruct((Bp, C), jnp.float32),
        scratch_shapes=[
            pltpu.VMEM((T * Bp, 8 * H), jnp.float32),   # hoisted X @ Wih + b
            pltpu.VMEM((T * Bp, H2), jnp.float32),      # inter-layer sequence
        ],
    )(x2d, lens, *flat_w, packed["fc_w_t"], packed["fc_b"])
    return out[:B]


# ----------------------------------------------------------------------------
# Pure-JAX reference (per-hand, per-gate, mirrors the PyTorch module)
# ----------------------------------------------------------------------------
def _lstm_layer_ref(x, wih, whh, b):
    T, B, D = x.shape
    H = whh.shape[-1]

    def step(carry, xt):
        h, c = carry

        def gate(idx):
            return xt @ wih[idx].T + h @ whh[idx].T + b[idx]

        i = jax.nn.sigmoid(gate(0))
        f = jax.nn.sigmoid(gate(1))
        g = jnp.tanh(gate(2))
        o = jax.nn.sigmoid(gate(3))
        c = f * c + i * g
        h = o * jnp.tanh(c)
        return (h, c), h

    init = (jnp.zeros((B, H), jnp.float32), jnp.zeros((B, H), jnp.float32))
    _, ys = lax.scan(step, init, x)
    return ys


def forward_ref(x, seq_lengths, params, input_size):
    T, B, _ = x.shape
    left = x[:, :, :input_size]
    right = x[:, :, input_size:]
    for (wih, whh, b) in params["left"]:
        left = _lstm_layer_ref(left, wih, whh, b)
    for (wih, whh, b) in params["right"]:
        right = _lstm_layer_ref(right, wih, whh, b)
    batch_idx = jnp.arange(B)
    feat = jnp.concatenate(
        [left[seq_lengths - 1, batch_idx], right[seq_lengths - 1, batch_idx]],
        axis=-1)
    return feat @ params["fc_w"].T + params["fc_b"][0]


# ----------------------------------------------------------------------------
# Deterministic parameter init (PyTorch nn.LSTM-style uniform(-1/sqrt(H), ..))
# ----------------------------------------------------------------------------
def init_params(key, input_size, hidden_size, num_layers, num_classes):
    k = 1.0 / jnp.sqrt(hidden_size)

    def uniform(key, shape):
        return jax.random.uniform(key, shape, jnp.float32, -k, k)

    def make_stack(key):
        layers = []
        for layer in range(num_layers):
            d_in = input_size if layer == 0 else hidden_size
            key, k1, k2, k3, k4 = jax.random.split(key, 5)
            wih = uniform(k1, (4, hidden_size, d_in))
            whh = uniform(k2, (4, hidden_size, hidden_size))
            b = (uniform(k3, (4, 1, hidden_size))
                 + uniform(k4, (4, 1, hidden_size)))  # b_ih + b_hh
            layers.append((wih, whh, b))
        return layers, key

    key_l, key_r, key_fc = jax.random.split(key, 3)
    left, _ = make_stack(key_l)
    right, _ = make_stack(key_r)
    kf = 1.0 / jnp.sqrt(2 * hidden_size)
    fc_w = jax.random.uniform(key_fc, (num_classes, 2 * hidden_size),
                              jnp.float32, -kf, kf)
    fc_b = jax.random.uniform(jax.random.fold_in(key_fc, 1),
                              (1, num_classes), jnp.float32, -kf, kf)
    return {"left": left, "right": right, "fc_w": fc_w, "fc_b": fc_b}


# ----------------------------------------------------------------------------
if __name__ == "__main__":
    input_size = 8
    hidden_size = 32
    num_layers = 2
    num_classes = 5
    T, B = 10, 4

    key = jax.random.PRNGKey(0)
    key_x, key_p = jax.random.split(key)

    seq_batch_coords = jax.random.normal(
        key_x, (T, B, 2 * input_size), jnp.float32)
    # pack_padded_sequence requires descending lengths.
    seq_lengths = jnp.array([10, 8, 6, 4], jnp.int32)

    params = init_params(key_p, input_size, hidden_size, num_layers,
                         num_classes)
    packed = pack_params(params)

    out = lstm_per_hand_forward(seq_batch_coords, seq_lengths, packed)
    out = jax.block_until_ready(out)

    ref = forward_ref(seq_batch_coords, seq_lengths, params, input_size)
    assert out.shape == (B, num_classes)
    assert jnp.allclose(out, ref, atol=1e-3, rtol=1e-3), (
        "Pallas output mismatch vs reference: "
        f"max abs diff = {jnp.max(jnp.abs(out - ref))}")

    print("KERNEL_OK")
</pallas_src>

<mosaic_0001>
module attributes {stable_mosaic.version = 11 : i64} {
  func.func @kernel(%arg0: memref<80x16xf32, #tpu.memory_space<vmem>>, %arg1: memref<8x1xi32, #tpu.memory_space<vmem>>, %arg2: memref<16x256xf32, #tpu.memory_space<vmem>>, %arg3: memref<64x256xf32, #tpu.memory_space<vmem>>, %arg4: memref<1x256xf32, #tpu.memory_space<vmem>>, %arg5: memref<64x256xf32, #tpu.memory_space<vmem>>, %arg6: memref<64x256xf32, #tpu.memory_space<vmem>>, %arg7: memref<1x256xf32, #tpu.memory_space<vmem>>, %arg8: memref<64x5xf32, #tpu.memory_space<vmem>>, %arg9: memref<1x5xf32, #tpu.memory_space<vmem>>, %arg10: memref<8x5xf32, #tpu.memory_space<vmem>>, %arg11: memref<80x256xf32, #tpu.memory_space<vmem>>, %arg12: memref<80x64xf32, #tpu.memory_space<vmem>>) attributes {dimension_semantics = [], scalar_prefetch = 0 : i64, scratch_operands = 2 : i64, tpu.core_type = #tpu.core_type<tc>} {
    %c0 = arith.constant 0 : index
    %c0_0 = arith.constant 0 : index
    %0 = vector.load %arg1[%c0, %c0_0] : memref<8x1xi32, #tpu.memory_space<vmem>>, vector<8x1xi32>
    %c1_i32 = arith.constant 1 : i32
    %1 = vector.broadcast %c1_i32 : i32 to vector<8x1xi32>
    %2 = arith.subi %0, %1 : vector<8x1xi32>
    %cst = arith.constant 0.000000e+00 : f32
    %3 = vector.broadcast %cst : f32 to vector<8x64xf32>
    %c0_1 = arith.constant 0 : index
    %c0_2 = arith.constant 0 : index
    %4 = vector.load %arg0[%c0_1, %c0_2] : memref<80x16xf32, #tpu.memory_space<vmem>>, vector<80x16xf32>
    %c0_3 = arith.constant 0 : index
    %c0_4 = arith.constant 0 : index
    %5 = vector.load %arg2[%c0_3, %c0_4] : memref<16x256xf32, #tpu.memory_space<vmem>>, vector<16x256xf32>
    %cst_5 = arith.constant dense<0.000000e+00> : vector<80x256xf32>
    %6 = tpu.matmul %4, %5, %cst_5 {dimension_numbers = #tpu.dot_dimension_numbers<[1], [0], [0], [1], [0, 0, 1, 1], [], []>} : vector<80x16xf32>, vector<16x256xf32>, vector<80x256xf32> -> vector<80x256xf32>
    %c0_6 = arith.constant 0 : index
    %c0_7 = arith.constant 0 : index
    %7 = vector.load %arg4[%c0_6, %c0_7] : memref<1x256xf32, #tpu.memory_space<vmem>>, vector<1x256xf32>
    %8 = vector.broadcast %7 : vector<1x256xf32> to vector<80x256xf32>
    %9 = arith.addf %6, %8 : vector<80x256xf32>
    %c0_8 = arith.constant 0 : index
    %c0_9 = arith.constant 0 : index
    %10 = vector.load %arg11[%c0_8, %c0_9] : memref<80x256xf32, #tpu.memory_space<vmem>>, vector<80x256xf32>
    tpu.vector_store %arg11[%c0_8, %c0_9], %9 {strides = array<i32>} : memref<80x256xf32, #tpu.memory_space<vmem>>, vector<80x256xf32>,
    %cst_10 = arith.constant 0.000000e+00 : f32
    %11 = vector.broadcast %cst_10 : f32 to vector<8x64xf32>
    %cst_11 = arith.constant 0.000000e+00 : f32
    %12 = vector.broadcast %cst_11 : f32 to vector<8x64xf32>
    %c0_12 = arith.constant 0 : index
    %c0_13 = arith.constant 0 : index
    %13 = vector.load %arg11[%c0_12, %c0_13] : memref<80x256xf32, #tpu.memory_space<vmem>>, vector<8x256xf32>
    %c0_14 = arith.constant 0 : index
    %c0_15 = arith.constant 0 : index
    %14 = vector.load %arg3[%c0_14, %c0_15] : memref<64x256xf32, #tpu.memory_space<vmem>>, vector<64x256xf32>
    %cst_16 = arith.constant dense<0.000000e+00> : vector<8x256xf32>
    %15 = tpu.matmul %11, %14, %cst_16 {dimension_numbers = #tpu.dot_dimension_numbers<[1], [0], [0], [1], [0, 0, 1, 1], [], []>} : vector<8x64xf32>, vector<64x256xf32>, vector<8x256xf32> -> vector<8x256xf32>
    %16 = arith.addf %13, %15 : vector<8x256xf32>
    %17 = vector.extract_strided_slice %16 {offsets = [0, 0], sizes = [8, 64], strides = [1, 1]} : vector<8x256xf32> to vector<8x64xf32>
    %18 = arith.negf %17 : vector<8x64xf32>
    %19 = math.exp %18 : vector<8x64xf32>
    %cst_17 = arith.constant 1.000000e+00 : f32
    %20 = vector.broadcast %cst_17 : f32 to vector<8x64xf32>
    %21 = arith.addf %20, %19 : vector<8x64xf32>
    %22 = arith.divf %20, %21 : vector<8x64xf32>
    %23 = vector.extract_strided_slice %16 {offsets = [0, 64], sizes = [8, 64], strides = [1, 1]} : vector<8x256xf32> to vector<8x64xf32>
    %24 = arith.negf %23 : vector<8x64xf32>
    %25 = math.exp %24 : vector<8x64xf32>
    %cst_18 = arith.constant 1.000000e+00 : f32
    %26 = vector.broadcast %cst_18 : f32 to vector<8x64xf32>
    %27 = arith.addf %26, %25 : vector<8x64xf32>
    %28 = arith.divf %26, %27 : vector<8x64xf32>
    %29 = vector.extract_strided_slice %16 {offsets = [0, 128], sizes = [8, 64], strides = [1, 1]} : vector<8x256xf32> to vector<8x64xf32>
    %30 = math.tanh %29 : vector<8x64xf32>
    %31 = vector.extract_strided_slice %16 {offsets = [0, 192], sizes = [8, 64], strides = [1, 1]} : vector<8x256xf32> to vector<8x64xf32>
    %32 = arith.negf %31 : vector<8x64xf32>
    %33 = math.exp %32 : vector<8x64xf32>
    %cst_19 = arith.constant 1.000000e+00 : f32
    %34 = vector.broadcast %cst_19 : f32 to vector<8x64xf32>
    %35 = arith.addf %34, %33 : vector<8x64xf32>
    %36 = arith.divf %34, %35 : vector<8x64xf32>
    %37 = arith.mulf %28, %12 : vector<8x64xf32>
    %38 = arith.mulf %22, %30 : vector<8x64xf32>
    %39 = arith.addf %37, %38 : vector<8x64xf32>
    %40 = math.tanh %39 : vector<8x64xf32>
    %41 = arith.mulf %36, %40 : vector<8x64xf32>
    %c0_20 = arith.constant 0 : index
    %c0_21 = arith.constant 0 : index
    %42 = vector.load %arg12[%c0_20, %c0_21] : memref<80x64xf32, #tpu.memory_space<vmem>>, vector<8x64xf32>
    tpu.vector_store %arg12[%c0_20, %c0_21], %41 {strides = array<i32>} : memref<80x64xf32, #tpu.memory_space<vmem>>, vector<8x64xf32>,
    %c8 = arith.constant 8 : index
    %c0_22 = arith.constant 0 : index
    %43 = vector.load %arg11[%c8, %c0_22] : memref<80x256xf32, #tpu.memory_space<vmem>>, vector<8x256xf32>
    %c0_23 = arith.constant 0 : index
    %c0_24 = arith.constant 0 : index
    %44 = vector.load %arg3[%c0_23, %c0_24] : memref<64x256xf32, #tpu.memory_space<vmem>>, vector<64x256xf32>
    %cst_25 = arith.constant dense<0.000000e+00> : vector<8x256xf32>
    %45 = tpu.matmul %41, %44, %cst_25 {dimension_numbers = #tpu.dot_dimension_numbers<[1], [0], [0], [1], [0, 0, 1, 1], [], []>} : vector<8x64xf32>, vector<64x256xf32>, vector<8x256xf32> -> vector<8x256xf32>
    %46 = arith.addf %43, %45 : vector<8x256xf32>
    %47 = vector.extract_strided_slice %46 {offsets = [0, 0], sizes = [8, 64], strides = [1, 1]} : vector<8x256xf32> to vector<8x64xf32>
    %48 = arith.negf %47 : vector<8x64xf32>
    %49 = math.exp %48 : vector<8x64xf32>
    %cst_26 = arith.constant 1.000000e+00 : f32
    %50 = vector.broadcast %cst_26 : f32 to vector<8x64xf32>
    %51 = arith.addf %50, %49 : vector<8x64xf32>
    %52 = arith.divf %50, %51 : vector<8x64xf32>
    %53 = vector.extract_strided_slice %46 {offsets = [0, 64], sizes = [8, 64], strides = [1, 1]} : vector<8x256xf32> to vector<8x64xf32>
    %54 = arith.negf %53 : vector<8x64xf32>
    %55 = math.exp %54 : vector<8x64xf32>
    %cst_27 = arith.constant 1.000000e+00 : f32
    %56 = vector.broadcast %cst_27 : f32 to vector<8x64xf32>
    %57 = arith.addf %56, %55 : vector<8x64xf32>
    %58 = arith.divf %56, %57 : vector<8x64xf32>
    %59 = vector.extract_strided_slice %46 {offsets = [0, 128], sizes = [8, 64], strides = [1, 1]} : vector<8x256xf32> to vector<8x64xf32>
    %60 = math.tanh %59 : vector<8x64xf32>
    %61 = vector.extract_strided_slice %46 {offsets = [0, 192], sizes = [8, 64], strides = [1, 1]} : vector<8x256xf32> to vector<8x64xf32>
    %62 = arith.negf %61 : vector<8x64xf32>
    %63 = math.exp %62 : vector<8x64xf32>
    %cst_28 = arith.constant 1.000000e+00 : f32
    %64 = vector.broadcast %cst_28 : f32 to vector<8x64xf32>
    %65 = arith.addf %64, %63 : vector<8x64xf32>
    %66 = arith.divf %64, %65 : vector<8x64xf32>
    %67 = arith.mulf %58, %39 : vector<8x64xf32>
    %68 = arith.mulf %52, %60 : vector<8x64xf32>
    %69 = arith.addf %67, %68 : vector<8x64xf32>
    %70 = math.tanh %69 : vector<8x64xf32>
    %71 = arith.mulf %66, %70 : vector<8x64xf32>
    %c8_29 = arith.constant 8 : index
    %c0_30 = arith.constant 0 : index
    %72 = vector.load %arg12[%c8_29, %c0_30] : memref<80x64xf32, #tpu.memory_space<vmem>>, vector<8x64xf32>
    tpu.vector_store %arg12[%c8_29, %c0_30], %71 {strides = array<i32>} : memref<80x64xf32, #tpu.memory_space<vmem>>, vector<8x64xf32>,
    %c16 = arith.constant 16 : index
    %c0_31 = arith.constant 0 : index
    %73 = vector.load %arg11[%c16, %c0_31] : memref<80x256xf32, #tpu.memory_space<vmem>>, vector<8x256xf32>
    %c0_32 = arith.constant 0 : index
    %c0_33 = arith.constant 0 : index
    %74 = vector.load %arg3[%c0_32, %c0_33] : memref<64x256xf32, #tpu.memory_space<vmem>>, vector<64x256xf32>
    %cst_34 = arith.constant dense<0.000000e+00> : vector<8x256xf32>
    %75 = tpu.matmul %71, %74, %cst_34 {dimension_numbers = #tpu.dot_dimension_numbers<[1], [0], [0], [1], [0, 0, 1, 1], [], []>} : vector<8x64xf32>, vector<64x256xf32>, vector<8x256xf32> -> vector<8x256xf32>
    %76 = arith.addf %73, %75 : vector<8x256xf32>
    %77 = vector.extract_strided_slice %76 {offsets = [0, 0], sizes = [8, 64], strides = [1, 1]} : vector<8x256xf32> to vector<8x64xf32>
    %78 = arith.negf %77 : vector<8x64xf32>
    %79 = math.exp %78 : vector<8x64xf32>
    %cst_35 = arith.constant 1.000000e+00 : f32
    %80 = vector.broadcast %cst_35 : f32 to vector<8x64xf32>
    %81 = arith.addf %80, %79 : vector<8x64xf32>
    %82 = arith.divf %80, %81 : vector<8x64xf32>
    %83 = vector.extract_strided_slice %76 {offsets = [0, 64], sizes = [8, 64], strides = [1, 1]} : vector<8x256xf32> to vector<8x64xf32>
    %84 = arith.negf %83 : vector<8x64xf32>
    %85 = math.exp %84 : vector<8x64xf32>
    %cst_36 = arith.constant 1.000000e+00 : f32
    %86 = vector.broadcast %cst_36 : f32 to vector<8x64xf32>
    %87 = arith.addf %86, %85 : vector<8x64xf32>
    %88 = arith.divf %86, %87 : vector<8x64xf32>
    %89 = vector.extract_strided_slice %76 {offsets = [0, 128], sizes = [8, 64], strides = [1, 1]} : vector<8x256xf32> to vector<8x64xf32>
    %90 = math.tanh %89 : vector<8x64xf32>
    %91 = vector.extract_strided_slice %76 {offsets = [0, 192], sizes = [8, 64], strides = [1, 1]} : vector<8x256xf32> to vector<8x64xf32>
    %92 = arith.negf %91 : vector<8x64xf32>
    %93 = math.exp %92 : vector<8x64xf32>
    %cst_37 = arith.constant 1.000000e+00 : f32
    %94 = vector.broadcast %cst_37 : f32 to vector<8x64xf32>
    %95 = arith.addf %94, %93 : vector<8x64xf32>
    %96 = arith.divf %94, %95 : vector<8x64xf32>
    %97 = arith.mulf %88, %69 : vector<8x64xf32>
    %98 = arith.mulf %82, %90 : vector<8x64xf32>
    %99 = arith.addf %97, %98 : vector<8x64xf32>
    %100 = math.tanh %99 : vector<8x64xf32>
    %101 = arith.mulf %96, %100 : vector<8x64xf32>
    %c16_38 = arith.constant 16 : index
    %c0_39 = arith.constant 0 : index
    %102 = vector.load %arg12[%c16_38, %c0_39] : memref<80x64xf32, #tpu.memory_space<vmem>>, vector<8x64xf32>
    tpu.vector_store %arg12[%c16_38, %c0_39], %101 {strides = array<i32>} : memref<80x64xf32, #tpu.memory_space<vmem>>, vector<8x64xf32>,
    %c24 = arith.constant 24 : index
    %c0_40 = arith.constant 0 : index
    %103 = vector.load %arg11[%c24, %c0_40] : memref<80x256xf32, #tpu.memory_space<vmem>>, vector<8x256xf32>
    %c0_41 = arith.constant 0 : index
    %c0_42 = arith.constant 0 : index
    %104 = vector.load %arg3[%c0_41, %c0_42] : memref<64x256xf32, #tpu.memory_space<vmem>>, vector<64x256xf32>
    %cst_43 = arith.constant dense<0.000000e+00> : vector<8x256xf32>
    %105 = tpu.matmul %101, %104, %cst_43 {dimension_numbers = #tpu.dot_dimension_numbers<[1], [0], [0], [1], [0, 0, 1, 1], [], []>} : vector<8x64xf32>, vector<64x256xf32>, vector<8x256xf32> -> vector<8x256xf32>
    %106 = arith.addf %103, %105 : vector<8x256xf32>
    %107 = vector.extract_strided_slice %106 {offsets = [0, 0], sizes = [8, 64], strides = [1, 1]} : vector<8x256xf32> to vector<8x64xf32>
    %108 = arith.negf %107 : vector<8x64xf32>
    %109 = math.exp %108 : vector<8x64xf32>
    %cst_44 = arith.constant 1.000000e+00 : f32
    %110 = vector.broadcast %cst_44 : f32 to vector<8x64xf32>
    %111 = arith.addf %110, %109 : vector<8x64xf32>
    %112 = arith.divf %110, %111 : vector<8x64xf32>
    %113 = vector.extract_strided_slice %106 {offsets = [0, 64], sizes = [8, 64], strides = [1, 1]} : vector<8x256xf32> to vector<8x64xf32>
    %114 = arith.negf %113 : vector<8x64xf32>
    %115 = math.exp %114 : vector<8x64xf32>
    %cst_45 = arith.constant 1.000000e+00 : f32
    %116 = vector.broadcast %cst_45 : f32 to vector<8x64xf32>
    %117 = arith.addf %116, %115 : vector<8x64xf32>
    %118 = arith.divf %116, %117 : vector<8x64xf32>
    %119 = vector.extract_strided_slice %106 {offsets = [0, 128], sizes = [8, 64], strides = [1, 1]} : vector<8x256xf32> to vector<8x64xf32>
    %120 = math.tanh %119 : vector<8x64xf32>
    %121 = vector.extract_strided_slice %106 {offsets = [0, 192], sizes = [8, 64], strides = [1, 1]} : vector<8x256xf32> to vector<8x64xf32>
    %122 = arith.negf %121 : vector<8x64xf32>
    %123 = math.exp %122 : vector<8x64xf32>
    %cst_46 = arith.constant 1.000000e+00 : f32
    %124 = vector.broadcast %cst_46 : f32 to vector<8x64xf32>
    %125 = arith.addf %124, %123 : vector<8x64xf32>
    %126 = arith.divf %124, %125 : vector<8x64xf32>
    %127 = arith.mulf %118, %99 : vector<8x64xf32>
    %128 = arith.mulf %112, %120 : vector<8x64xf32>
    %129 = arith.addf %127, %128 : vector<8x64xf32>
    %130 = math.tanh %129 : vector<8x64xf32>
    %131 = arith.mulf %126, %130 : vector<8x64xf32>
    %c24_47 = arith.constant 24 : index
    %c0_48 = arith.constant 0 : index
    %132 = vector.load %arg12[%c24_47, %c0_48] : memref<80x64xf32, #tpu.memory_space<vmem>>, vector<8x64xf32>
    tpu.vector_store %arg12[%c24_47, %c0_48], %131 {strides = array<i32>} : memref<80x64xf32, #tpu.memory_space<vmem>>, vector<8x64xf32>,
    %c32 = arith.constant 32 : index
    %c0_49 = arith.constant 0 : index
    %133 = vector.load %arg11[%c32, %c0_49] : memref<80x256xf32, #tpu.memory_space<vmem>>, vector<8x256xf32>
    %c0_50 = arith.constant 0 : index
    %c0_51 = arith.constant 0 : index
    %134 = vector.load %arg3[%c0_50, %c0_51] : memref<64x256xf32, #tpu.memory_space<vmem>>, vector<64x256xf32>
    %cst_52 = arith.constant dense<0.000000e+00> : vector<8x256xf32>
    %135 = tpu.matmul %131, %134, %cst_52 {dimension_numbers = #tpu.dot_dimension_numbers<[1], [0], [0], [1], [0, 0, 1, 1], [], []>} : vector<8x64xf32>, vector<64x256xf32>, vector<8x256xf32> -> vector<8x256xf32>
    %136 = arith.addf %133, %135 : vector<8x256xf32>
    %137 = vector.extract_strided_slice %136 {offsets = [0, 0], sizes = [8, 64], strides = [1, 1]} : vector<8x256xf32> to vector<8x64xf32>
    %138 = arith.negf %137 : vector<8x64xf32>
    %139 = math.exp %138 : vector<8x64xf32>
    %cst_53 = arith.constant 1.000000e+00 : f32
    %140 = vector.broadcast %cst_53 : f32 to vector<8x64xf32>
    %141 = arith.addf %140, %139 : vector<8x64xf32>
    %142 = arith.divf %140, %141 : vector<8x64xf32>
    %143 = vector.extract_strided_slice %136 {offsets = [0, 64], sizes = [8, 64], strides = [1, 1]} : vector<8x256xf32> to vector<8x64xf32>
    %144 = arith.negf %143 : vector<8x64xf32>
    %145 = math.exp %144 : vector<8x64xf32>
    %cst_54 = arith.constant 1.000000e+00 : f32
    %146 = vector.broadcast %cst_54 : f32 to vector<8x64xf32>
    %147 = arith.addf %146, %145 : vector<8x64xf32>
    %148 = arith.divf %146, %147 : vector<8x64xf32>
    %149 = vector.extract_strided_slice %136 {offsets = [0, 128], sizes = [8, 64], strides = [1, 1]} : vector<8x256xf32> to vector<8x64xf32>
    %150 = math.tanh %149 : vector<8x64xf32>
    %151 = vector.extract_strided_slice %136 {offsets = [0, 192], sizes = [8, 64], strides = [1, 1]} : vector<8x256xf32> to vector<8x64xf32>
    %152 = arith.negf %151 : vector<8x64xf32>
    %153 = math.exp %152 : vector<8x64xf32>
    %cst_55 = arith.constant 1.000000e+00 : f32
    %154 = vector.broadcast %cst_55 : f32 to vector<8x64xf32>
    %155 = arith.addf %154, %153 : vector<8x64xf32>
    %156 = arith.divf %154, %155 : vector<8x64xf32>
    %157 = arith.mulf %148, %129 : vector<8x64xf32>
    %158 = arith.mulf %142, %150 : vector<8x64xf32>
    %159 = arith.addf %157, %158 : vector<8x64xf32>
    %160 = math.tanh %159 : vector<8x64xf32>
    %161 = arith.mulf %156, %160 : vector<8x64xf32>
    %c32_56 = arith.constant 32 : index
    %c0_57 = arith.constant 0 : index
    %162 = vector.load %arg12[%c32_56, %c0_57] : memref<80x64xf32, #tpu.memory_space<vmem>>, vector<8x64xf32>
    tpu.vector_store %arg12[%c32_56, %c0_57], %161 {strides = array<i32>} : memref<80x64xf32, #tpu.memory_space<vmem>>, vector<8x64xf32>,
    %c40 = arith.constant 40 : index
    %c0_58 = arith.constant 0 : index
    %163 = vector.load %arg11[%c40, %c0_58] : memref<80x256xf32, #tpu.memory_space<vmem>>, vector<8x256xf32>
    %c0_59 = arith.constant 0 : index
    %c0_60 = arith.constant 0 : index
    %164 = vector.load %arg3[%c0_59, %c0_60] : memref<64x256xf32, #tpu.memory_space<vmem>>, vector<64x256xf32>
    %cst_61 = arith.constant dense<0.000000e+00> : vector<8x256xf32>
    %165 = tpu.matmul %161, %164, %cst_61 {dimension_numbers = #tpu.dot_dimension_numbers<[1], [0], [0], [1], [0, 0, 1, 1], [], []>} : vector<8x64xf32>, vector<64x256xf32>, vector<8x256xf32> -> vector<8x256xf32>
    %166 = arith.addf %163, %165 : vector<8x256xf32>
    %167 = vector.extract_strided_slice %166 {offsets = [0, 0], sizes = [8, 64], strides = [1, 1]} : vector<8x256xf32> to vector<8x64xf32>
    %168 = arith.negf %167 : vector<8x64xf32>
    %169 = math.exp %168 : vector<8x64xf32>
    %cst_62 = arith.constant 1.000000e+00 : f32
    %170 = vector.broadcast %cst_62 : f32 to vector<8x64xf32>
    %171 = arith.addf %170, %169 : vector<8x64xf32>
    %172 = arith.divf %170, %171 : vector<8x64xf32>
    %173 = vector.extract_strided_slice %166 {offsets = [0, 64], sizes = [8, 64], strides = [1, 1]} : vector<8x256xf32> to vector<8x64xf32>
    %174 = arith.negf %173 : vector<8x64xf32>
    %175 = math.exp %174 : vector<8x64xf32>
    %cst_63 = arith.constant 1.000000e+00 : f32
    %176 = vector.broadcast %cst_63 : f32 to vector<8x64xf32>
    %177 = arith.addf %176, %175 : vector<8x64xf32>
    %178 = arith.divf %176, %177 : vector<8x64xf32>
    %179 = vector.extract_strided_slice %166 {offsets = [0, 128], sizes = [8, 64], strides = [1, 1]} : vector<8x256xf32> to vector<8x64xf32>
    %180 = math.tanh %179 : vector<8x64xf32>
    %181 = vector.extract_strided_slice %166 {offsets = [0, 192], sizes = [8, 64], strides = [1, 1]} : vector<8x256xf32> to vector<8x64xf32>
    %182 = arith.negf %181 : vector<8x64xf32>
    %183 = math.exp %182 : vector<8x64xf32>
    %cst_64 = arith.constant 1.000000e+00 : f32
    %184 = vector.broadcast %cst_64 : f32 to vector<8x64xf32>
    %185 = arith.addf %184, %183 : vector<8x64xf32>
    %186 = arith.divf %184, %185 : vector<8x64xf32>
    %187 = arith.mulf %178, %159 : vector<8x64xf32>
    %188 = arith.mulf %172, %180 : vector<8x64xf32>
    %189 = arith.addf %187, %188 : vector<8x64xf32>
    %190 = math.tanh %189 : vector<8x64xf32>
    %191 = arith.mulf %186, %190 : vector<8x64xf32>
    %c40_65 = arith.constant 40 : index
    %c0_66 = arith.constant 0 : index
    %192 = vector.load %arg12[%c40_65, %c0_66] : memref<80x64xf32, #tpu.memory_space<vmem>>, vector<8x64xf32>
    tpu.vector_store %arg12[%c40_65, %c0_66], %191 {strides = array<i32>} : memref<80x64xf32, #tpu.memory_space<vmem>>, vector<8x64xf32>,
    %c48 = arith.constant 48 : index
    %c0_67 = arith.constant 0 : index
    %193 = vector.load %arg11[%c48, %c0_67] : memref<80x256xf32, #tpu.memory_space<vmem>>, vector<8x256xf32>
    %c0_68 = arith.constant 0 : index
    %c0_69 = arith.constant 0 : index
    %194 = vector.load %arg3[%c0_68, %c0_69] : memref<64x256xf32, #tpu.memory_space<vmem>>, vector<64x256xf32>
    %cst_70 = arith.constant dense<0.000000e+00> : vector<8x256xf32>
    %195 = tpu.matmul %191, %194, %cst_70 {dimension_numbers = #tpu.dot_dimension_numbers<[1], [0], [0], [1], [0, 0, 1, 1], [], []>} : vector<8x64xf32>, vector<64x256xf32>, vector<8x256xf32> -> vector<8x256xf32>
    %196 = arith.addf %193, %195 : vector<8x256xf32>
    %197 = vector.extract_strided_slice %196 {offsets = [0, 0], sizes = [8, 64], strides = [1, 1]} : vector<8x256xf32> to vector<8x64xf32>
    %198 = arith.negf %197 : vector<8x64xf32>
    %199 = math.exp %198 : vector<8x64xf32>
    %cst_71 = arith.constant 1.000000e+00 : f32
    %200 = vector.broadcast %cst_71 : f32 to vector<8x64xf32>
    %201 = arith.addf %200, %199 : vector<8x64xf32>
    %202 = arith.divf %200, %201 : vector<8x64xf32>
    %203 = vector.extract_strided_slice %196 {offsets = [0, 64], sizes = [8, 64], strides = [1, 1]} : vector<8x256xf32> to vector<8x64xf32>
    %204 = arith.negf %203 : vector<8x64xf32>
    %205 = math.exp %204 : vector<8x64xf32>
    %cst_72 = arith.constant 1.000000e+00 : f32
    %206 = vector.broadcast %cst_72 : f32 to vector<8x64xf32>
    %207 = arith.addf %206, %205 : vector<8x64xf32>
    %208 = arith.divf %206, %207 : vector<8x64xf32>
    %209 = vector.extract_strided_slice %196 {offsets = [0, 128], sizes = [8, 64], strides = [1, 1]} : vector<8x256xf32> to vector<8x64xf32>
    %210 = math.tanh %209 : vector<8x64xf32>
    %211 = vector.extract_strided_slice %196 {offsets = [0, 192], sizes = [8, 64], strides = [1, 1]} : vector<8x256xf32> to vector<8x64xf32>
    %212 = arith.negf %211 : vector<8x64xf32>
    %213 = math.exp %212 : vector<8x64xf32>
    %cst_73 = arith.constant 1.000000e+00 : f32
    %214 = vector.broadcast %cst_73 : f32 to vector<8x64xf32>
    %215 = arith.addf %214, %213 : vector<8x64xf32>
    %216 = arith.divf %214, %215 : vector<8x64xf32>
    %217 = arith.mulf %208, %189 : vector<8x64xf32>
    %218 = arith.mulf %202, %210 : vector<8x64xf32>
    %219 = arith.addf %217, %218 : vector<8x64xf32>
    %220 = math.tanh %219 : vector<8x64xf32>
    %221 = arith.mulf %216, %220 : vector<8x64xf32>
    %c48_74 = arith.constant 48 : index
    %c0_75 = arith.constant 0 : index
    %222 = vector.load %arg12[%c48_74, %c0_75] : memref<80x64xf32, #tpu.memory_space<vmem>>, vector<8x64xf32>
    tpu.vector_store %arg12[%c48_74, %c0_75], %221 {strides = array<i32>} : memref<80x64xf32, #tpu.memory_space<vmem>>, vector<8x64xf32>,
    %c56 = arith.constant 56 : index
    %c0_76 = arith.constant 0 : index
    %223 = vector.load %arg11[%c56, %c0_76] : memref<80x256xf32, #tpu.memory_space<vmem>>, vector<8x256xf32>
    %c0_77 = arith.constant 0 : index
    %c0_78 = arith.constant 0 : index
    %224 = vector.load %arg3[%c0_77, %c0_78] : memref<64x256xf32, #tpu.memory_space<vmem>>, vector<64x256xf32>
    %cst_79 = arith.constant dense<0.000000e+00> : vector<8x256xf32>
    %225 = tpu.matmul %221, %224, %cst_79 {dimension_numbers = #tpu.dot_dimension_numbers<[1], [0], [0], [1], [0, 0, 1, 1], [], []>} : vector<8x64xf32>, vector<64x256xf32>, vector<8x256xf32> -> vector<8x256xf32>
    %226 = arith.addf %223, %225 : vector<8x256xf32>
    %227 = vector.extract_strided_slice %226 {offsets = [0, 0], sizes = [8, 64], strides = [1, 1]} : vector<8x256xf32> to vector<8x64xf32>
    %228 = arith.negf %227 : vector<8x64xf32>
    %229 = math.exp %228 : vector<8x64xf32>
    %cst_80 = arith.constant 1.000000e+00 : f32
    %230 = vector.broadcast %cst_80 : f32 to vector<8x64xf32>
    %231 = arith.addf %230, %229 : vector<8x64xf32>
    %232 = arith.divf %230, %231 : vector<8x64xf32>
    %233 = vector.extract_strided_slice %226 {offsets = [0, 64], sizes = [8, 64], strides = [1, 1]} : vector<8x256xf32> to vector<8x64xf32>
    %234 = arith.negf %233 : vector<8x64xf32>
    %235 = math.exp %234 : vector<8x64xf32>
    %cst_81 = arith.constant 1.000000e+00 : f32
    %236 = vector.broadcast %cst_81 : f32 to vector<8x64xf32>
    %237 = arith.addf %236, %235 : vector<8x64xf32>
    %238 = arith.divf %236, %237 : vector<8x64xf32>
    %239 = vector.extract_strided_slice %226 {offsets = [0, 128], sizes = [8, 64], strides = [1, 1]} : vector<8x256xf32> to vector<8x64xf32>
    %240 = math.tanh %239 : vector<8x64xf32>
    %241 = vector.extract_strided_slice %226 {offsets = [0, 192], sizes = [8, 64], strides = [1, 1]} : vector<8x256xf32> to vector<8x64xf32>
    %242 = arith.negf %241 : vector<8x64xf32>
    %243 = math.exp %242 : vector<8x64xf32>
    %cst_82 = arith.constant 1.000000e+00 : f32
    %244 = vector.broadcast %cst_82 : f32 to vector<8x64xf32>
    %245 = arith.addf %244, %243 : vector<8x64xf32>
    %246 = arith.divf %244, %245 : vector<8x64xf32>
    %247 = arith.mulf %238, %219 : vector<8x64xf32>
    %248 = arith.mulf %232, %240 : vector<8x64xf32>
    %249 = arith.addf %247, %248 : vector<8x64xf32>
    %250 = math.tanh %249 : vector<8x64xf32>
    %251 = arith.mulf %246, %250 : vector<8x64xf32>
    %c56_83 = arith.constant 56 : index
    %c0_84 = arith.constant 0 : index
    %252 = vector.load %arg12[%c56_83, %c0_84] : memref<80x64xf32, #tpu.memory_space<vmem>>, vector<8x64xf32>
    tpu.vector_store %arg12[%c56_83, %c0_84], %251 {strides = array<i32>} : memref<80x64xf32, #tpu.memory_space<vmem>>, vector<8x64xf32>,
    %c64 = arith.constant 64 : index
    %c0_85 = arith.constant 0 : index
    %253 = vector.load %arg11[%c64, %c0_85] : memref<80x256xf32, #tpu.memory_space<vmem>>, vector<8x256xf32>
    %c0_86 = arith.constant 0 : index
    %c0_87 = arith.constant 0 : index
    %254 = vector.load %arg3[%c0_86, %c0_87] : memref<64x256xf32, #tpu.memory_space<vmem>>, vector<64x256xf32>
    %cst_88 = arith.constant dense<0.000000e+00> : vector<8x256xf32>
    %255 = tpu.matmul %251, %254, %cst_88 {dimension_numbers = #tpu.dot_dimension_numbers<[1], [0], [0], [1], [0, 0, 1, 1], [], []>} : vector<8x64xf32>, vector<64x256xf32>, vector<8x256xf32> -> vector<8x256xf32>
    %256 = arith.addf %253, %255 : vector<8x256xf32>
    %257 = vector.extract_strided_slice %256 {offsets = [0, 0], sizes = [8, 64], strides = [1, 1]} : vector<8x256xf32> to vector<8x64xf32>
    %258 = arith.negf %257 : vector<8x64xf32>
    %259 = math.exp %258 : vector<8x64xf32>
    %cst_89 = arith.constant 1.000000e+00 : f32
    %260 = vector.broadcast %cst_89 : f32 to vector<8x64xf32>
    %261 = arith.addf %260, %259 : vector<8x64xf32>
    %262 = arith.divf %260, %261 : vector<8x64xf32>
    %263 = vector.extract_strided_slice %256 {offsets = [0, 64], sizes = [8, 64], strides = [1, 1]} : vector<8x256xf32> to vector<8x64xf32>
    %264 = arith.negf %263 : vector<8x64xf32>
    %265 = math.exp %264 : vector<8x64xf32>
    %cst_90 = arith.constant 1.000000e+00 : f32
    %266 = vector.broadcast %cst_90 : f32 to vector<8x64xf32>
    %267 = arith.addf %266, %265 : vector<8x64xf32>
    %268 = arith.divf %266, %267 : vector<8x64xf32>
    %269 = vector.extract_strided_slice %256 {offsets = [0, 128], sizes = [8, 64], strides = [1, 1]} : vector<8x256xf32> to vector<8x64xf32>
    %270 = math.tanh %269 : vector<8x64xf32>
    %271 = vector.extract_strided_slice %256 {offsets = [0, 192], sizes = [8, 64], strides = [1, 1]} : vector<8x256xf32> to vector<8x64xf32>
    %272 = arith.negf %271 : vector<8x64xf32>
    %273 = math.exp %272 : vector<8x64xf32>
    %cst_91 = arith.constant 1.000000e+00 : f32
    %274 = vector.broadcast %cst_91 : f32 to vector<8x64xf32>
    %275 = arith.addf %274, %273 : vector<8x64xf32>
    %276 = arith.divf %274, %275 : vector<8x64xf32>
    %277 = arith.mulf %268, %249 : vector<8x64xf32>
    %278 = arith.mulf %262, %270 : vector<8x64xf32>
    %279 = arith.addf %277, %278 : vector<8x64xf32>
    %280 = math.tanh %279 : vector<8x64xf32>
    %281 = arith.mulf %276, %280 : vector<8x64xf32>
    %c64_92 = arith.constant 64 : index
    %c0_93 = arith.constant 0 : index
    %282 = vector.load %arg12[%c64_92, %c0_93] : memref<80x64xf32, #tpu.memory_space<vmem>>, vector<8x64xf32>
    tpu.vector_store %arg12[%c64_92, %c0_93], %281 {strides = array<i32>} : memref<80x64xf32, #tpu.memory_space<vmem>>, vector<8x64xf32>,
    %c72 = arith.constant 72 : index
    %c0_94 = arith.constant 0 : index
    %283 = vector.load %arg11[%c72, %c0_94] : memref<80x256xf32, #tpu.memory_space<vmem>>, vector<8x256xf32>
    %c0_95 = arith.constant 0 : index
    %c0_96 = arith.constant 0 : index
    %284 = vector.load %arg3[%c0_95, %c0_96] : memref<64x256xf32, #tpu.memory_space<vmem>>, vector<64x256xf32>
    %cst_97 = arith.constant dense<0.000000e+00> : vector<8x256xf32>
    %285 = tpu.matmul %281, %284, %cst_97 {dimension_numbers = #tpu.dot_dimension_numbers<[1], [0], [0], [1], [0, 0, 1, 1], [], []>} : vector<8x64xf32>, vector<64x256xf32>, vector<8x256xf32> -> vector<8x256xf32>
    %286 = arith.addf %283, %285 : vector<8x256xf32>
    %287 = vector.extract_strided_slice %286 {offsets = [0, 0], sizes = [8, 64], strides = [1, 1]} : vector<8x256xf32> to vector<8x64xf32>
    %288 = arith.negf %287 : vector<8x64xf32>
    %289 = math.exp %288 : vector<8x64xf32>
    %cst_98 = arith.constant 1.000000e+00 : f32
    %290 = vector.broadcast %cst_98 : f32 to vector<8x64xf32>
    %291 = arith.addf %290, %289 : vector<8x64xf32>
    %292 = arith.divf %290, %291 : vector<8x64xf32>
    %293 = vector.extract_strided_slice %286 {offsets = [0, 64], sizes = [8, 64], strides = [1, 1]} : vector<8x256xf32> to vector<8x64xf32>
    %294 = arith.negf %293 : vector<8x64xf32>
    %295 = math.exp %294 : vector<8x64xf32>
    %cst_99 = arith.constant 1.000000e+00 : f32
    %296 = vector.broadcast %cst_99 : f32 to vector<8x64xf32>
    %297 = arith.addf %296, %295 : vector<8x64xf32>
    %298 = arith.divf %296, %297 : vector<8x64xf32>
    %299 = vector.extract_strided_slice %286 {offsets = [0, 128], sizes = [8, 64], strides = [1, 1]} : vector<8x256xf32> to vector<8x64xf32>
    %300 = math.tanh %299 : vector<8x64xf32>
    %301 = vector.extract_strided_slice %286 {offsets = [0, 192], sizes = [8, 64], strides = [1, 1]} : vector<8x256xf32> to vector<8x64xf32>
    %302 = arith.negf %301 : vector<8x64xf32>
    %303 = math.exp %302 : vector<8x64xf32>
    %cst_100 = arith.constant 1.000000e+00 : f32
    %304 = vector.broadcast %cst_100 : f32 to vector<8x64xf32>
    %305 = arith.addf %304, %303 : vector<8x64xf32>
    %306 = arith.divf %304, %305 : vector<8x64xf32>
    %307 = arith.mulf %298, %279 : vector<8x64xf32>
    %308 = arith.mulf %292, %300 : vector<8x64xf32>
    %309 = arith.addf %307, %308 : vector<8x64xf32>
    %310 = math.tanh %309 : vector<8x64xf32>
    %311 = arith.mulf %306, %310 : vector<8x64xf32>
    %c72_101 = arith.constant 72 : index
    %c0_102 = arith.constant 0 : index
    %312 = vector.load %arg12[%c72_101, %c0_102] : memref<80x64xf32, #tpu.memory_space<vmem>>, vector<8x64xf32>
    tpu.vector_store %arg12[%c72_101, %c0_102], %311 {strides = array<i32>} : memref<80x64xf32, #tpu.memory_space<vmem>>, vector<8x64xf32>,
    %c0_103 = arith.constant 0 : index
    %c0_104 = arith.constant 0 : index
    %313 = vector.load %arg12[%c0_103, %c0_104] : memref<80x64xf32, #tpu.memory_space<vmem>>, vector<80x64xf32>
    %c0_105 = arith.constant 0 : index
    %c0_106 = arith.constant 0 : index
    %314 = vector.load %arg5[%c0_105, %c0_106] : memref<64x256xf32, #tpu.memory_space<vmem>>, vector<64x256xf32>
    %cst_107 = arith.constant dense<0.000000e+00> : vector<80x256xf32>
    %315 = tpu.matmul %313, %314, %cst_107 {dimension_numbers = #tpu.dot_dimension_numbers<[1], [0], [0], [1], [0, 0, 1, 1], [], []>} : vector<80x64xf32>, vector<64x256xf32>, vector<80x256xf32> -> vector<80x256xf32>
    %c0_108 = arith.constant 0 : index
    %c0_109 = arith.constant 0 : index
    %316 = vector.load %arg7[%c0_108, %c0_109] : memref<1x256xf32, #tpu.memory_space<vmem>>, vector<1x256xf32>
    %317 = vector.broadcast %316 : vector<1x256xf32> to vector<80x256xf32>
    %318 = arith.addf %315, %317 : vector<80x256xf32>
    %c0_110 = arith.constant 0 : index
    %c0_111 = arith.constant 0 : index
    %319 = vector.load %arg11[%c0_110, %c0_111] : memref<80x256xf32, #tpu.memory_space<vmem>>, vector<80x256xf32>
    tpu.vector_store %arg11[%c0_110, %c0_111], %318 {strides = array<i32>} : memref<80x256xf32, #tpu.memory_space<vmem>>, vector<80x256xf32>,
    %cst_112 = arith.constant 0.000000e+00 : f32
    %320 = vector.broadcast %cst_112 : f32 to vector<8x64xf32>
    %cst_113 = arith.constant 0.000000e+00 : f32
    %321 = vector.broadcast %cst_113 : f32 to vector<8x64xf32>
    %c0_114 = arith.constant 0 : index
    %c0_115 = arith.constant 0 : index
    %322 = vector.load %arg11[%c0_114, %c0_115] : memref<80x256xf32, #tpu.memory_space<vmem>>, vector<8x256xf32>
    %c0_116 = arith.constant 0 : index
    %c0_117 = arith.constant 0 : index
    %323 = vector.load %arg6[%c0_116, %c0_117] : memref<64x256xf32, #tpu.memory_space<vmem>>, vector<64x256xf32>
    %cst_118 = arith.constant dense<0.000000e+00> : vector<8x256xf32>
    %324 = tpu.matmul %320, %323, %cst_118 {dimension_numbers = #tpu.dot_dimension_numbers<[1], [0], [0], [1], [0, 0, 1, 1], [], []>} : vector<8x64xf32>, vector<64x256xf32>, vector<8x256xf32> -> vector<8x256xf32>
    %325 = arith.addf %322, %324 : vector<8x256xf32>
    %326 = vector.extract_strided_slice %325 {offsets = [0, 0], sizes = [8, 64], strides = [1, 1]} : vector<8x256xf32> to vector<8x64xf32>
    %327 = arith.negf %326 : vector<8x64xf32>
    %328 = math.exp %327 : vector<8x64xf32>
    %cst_119 = arith.constant 1.000000e+00 : f32
    %329 = vector.broadcast %cst_119 : f32 to vector<8x64xf32>
    %330 = arith.addf %329, %328 : vector<8x64xf32>
    %331 = arith.divf %329, %330 : vector<8x64xf32>
    %332 = vector.extract_strided_slice %325 {offsets = [0, 64], sizes = [8, 64], strides = [1, 1]} : vector<8x256xf32> to vector<8x64xf32>
    %333 = arith.negf %332 : vector<8x64xf32>
    %334 = math.exp %333 : vector<8x64xf32>
    %cst_120 = arith.constant 1.000000e+00 : f32
    %335 = vector.broadcast %cst_120 : f32 to vector<8x64xf32>
    %336 = arith.addf %335, %334 : vector<8x64xf32>
    %337 = arith.divf %335, %336 : vector<8x64xf32>
    %338 = vector.extract_strided_slice %325 {offsets = [0, 128], sizes = [8, 64], strides = [1, 1]} : vector<8x256xf32> to vector<8x64xf32>
    %339 = math.tanh %338 : vector<8x64xf32>
    %340 = vector.extract_strided_slice %325 {offsets = [0, 192], sizes = [8, 64], strides = [1, 1]} : vector<8x256xf32> to vector<8x64xf32>
    %341 = arith.negf %340 : vector<8x64xf32>
    %342 = math.exp %341 : vector<8x64xf32>
    %cst_121 = arith.constant 1.000000e+00 : f32
    %343 = vector.broadcast %cst_121 : f32 to vector<8x64xf32>
    %344 = arith.addf %343, %342 : vector<8x64xf32>
    %345 = arith.divf %343, %344 : vector<8x64xf32>
    %346 = arith.mulf %337, %321 : vector<8x64xf32>
    %347 = arith.mulf %331, %339 : vector<8x64xf32>
    %348 = arith.addf %346, %347 : vector<8x64xf32>
    %349 = math.tanh %348 : vector<8x64xf32>
    %350 = arith.mulf %345, %349 : vector<8x64xf32>
    %c0_i32 = arith.constant 0 : i32
    %351 = vector.broadcast %c0_i32 : i32 to vector<8x1xi32>
    %352 = arith.cmpi eq, %2, %351 : vector<8x1xi32>
    %353 = vector.shape_cast %352 : vector<8x1xi1> to vector<8x1xi1>
    %354 = vector.broadcast %353 : vector<8x1xi1> to vector<8x64xi1>
    %355 = arith.select %354, %350, %3 : vector<8x64xi1>, vector<8x64xf32>
    %c8_122 = arith.constant 8 : index
    %c0_123 = arith.constant 0 : index
    %356 = vector.load %arg11[%c8_122, %c0_123] : memref<80x256xf32, #tpu.memory_space<vmem>>, vector<8x256xf32>
    %c0_124 = arith.constant 0 : index
    %c0_125 = arith.constant 0 : index
    %357 = vector.load %arg6[%c0_124, %c0_125] : memref<64x256xf32, #tpu.memory_space<vmem>>, vector<64x256xf32>
    %cst_126 = arith.constant dense<0.000000e+00> : vector<8x256xf32>
    %358 = tpu.matmul %350, %357, %cst_126 {dimension_numbers = #tpu.dot_dimension_numbers<[1], [0], [0], [1], [0, 0, 1, 1], [], []>} : vector<8x64xf32>, vector<64x256xf32>, vector<8x256xf32> -> vector<8x256xf32>
    %359 = arith.addf %356, %358 : vector<8x256xf32>
    %360 = vector.extract_strided_slice %359 {offsets = [0, 0], sizes = [8, 64], strides = [1, 1]} : vector<8x256xf32> to vector<8x64xf32>
    %361 = arith.negf %360 : vector<8x64xf32>
    %362 = math.exp %361 : vector<8x64xf32>
    %cst_127 = arith.constant 1.000000e+00 : f32
    %363 = vector.broadcast %cst_127 : f32 to vector<8x64xf32>
    %364 = arith.addf %363, %362 : vector<8x64xf32>
    %365 = arith.divf %363, %364 : vector<8x64xf32>
    %366 = vector.extract_strided_slice %359 {offsets = [0, 64], sizes = [8, 64], strides = [1, 1]} : vector<8x256xf32> to vector<8x64xf32>
    %367 = arith.negf %366 : vector<8x64xf32>
    %368 = math.exp %367 : vector<8x64xf32>
    %cst_128 = arith.constant 1.000000e+00 : f32
    %369 = vector.broadcast %cst_128 : f32 to vector<8x64xf32>
    %370 = arith.addf %369, %368 : vector<8x64xf32>
    %371 = arith.divf %369, %370 : vector<8x64xf32>
    %372 = vector.extract_strided_slice %359 {offsets = [0, 128], sizes = [8, 64], strides = [1, 1]} : vector<8x256xf32> to vector<8x64xf32>
    %373 = math.tanh %372 : vector<8x64xf32>
    %374 = vector.extract_strided_slice %359 {offsets = [0, 192], sizes = [8, 64], strides = [1, 1]} : vector<8x256xf32> to vector<8x64xf32>
    %375 = arith.negf %374 : vector<8x64xf32>
    %376 = math.exp %375 : vector<8x64xf32>
    %cst_129 = arith.constant 1.000000e+00 : f32
    %377 = vector.broadcast %cst_129 : f32 to vector<8x64xf32>
    %378 = arith.addf %377, %376 : vector<8x64xf32>
    %379 = arith.divf %377, %378 : vector<8x64xf32>
    %380 = arith.mulf %371, %348 : vector<8x64xf32>
    %381 = arith.mulf %365, %373 : vector<8x64xf32>
    %382 = arith.addf %380, %381 : vector<8x64xf32>
    %383 = math.tanh %382 : vector<8x64xf32>
    %384 = arith.mulf %379, %383 : vector<8x64xf32>
    %c1_i32_130 = arith.constant 1 : i32
    %385 = vector.broadcast %c1_i32_130 : i32 to vector<8x1xi32>
    %386 = arith.cmpi eq, %2, %385 : vector<8x1xi32>
    %387 = vector.shape_cast %386 : vector<8x1xi1> to vector<8x1xi1>
    %388 = vector.broadcast %387 : vector<8x1xi1> to vector<8x64xi1>
    %389 = arith.select %388, %384, %355 : vector<8x64xi1>, vector<8x64xf32>
    %c16_131 = arith.constant 16 : index
    %c0_132 = arith.constant 0 : index
    %390 = vector.load %arg11[%c16_131, %c0_132] : memref<80x256xf32, #tpu.memory_space<vmem>>, vector<8x256xf32>
    %c0_133 = arith.constant 0 : index
    %c0_134 = arith.constant 0 : index
    %391 = vector.load %arg6[%c0_133, %c0_134] : memref<64x256xf32, #tpu.memory_space<vmem>>, vector<64x256xf32>
    %cst_135 = arith.constant dense<0.000000e+00> : vector<8x256xf32>
    %392 = tpu.matmul %384, %391, %cst_135 {dimension_numbers = #tpu.dot_dimension_numbers<[1], [0], [0], [1], [0, 0, 1, 1], [], []>} : vector<8x64xf32>, vector<64x256xf32>, vector<8x256xf32> -> vector<8x256xf32>
    %393 = arith.addf %390, %392 : vector<8x256xf32>
    %394 = vector.extract_strided_slice %393 {offsets = [0, 0], sizes = [8, 64], strides = [1, 1]} : vector<8x256xf32> to vector<8x64xf32>
    %395 = arith.negf %394 : vector<8x64xf32>
    %396 = math.exp %395 : vector<8x64xf32>
    %cst_136 = arith.constant 1.000000e+00 : f32
    %397 = vector.broadcast %cst_136 : f32 to vector<8x64xf32>
    %398 = arith.addf %397, %396 : vector<8x64xf32>
    %399 = arith.divf %397, %398 : vector<8x64xf32>
    %400 = vector.extract_strided_slice %393 {offsets = [0, 64], sizes = [8, 64], strides = [1, 1]} : vector<8x256xf32> to vector<8x64xf32>
    %401 = arith.negf %400 : vector<8x64xf32>
    %402 = math.exp %401 : vector<8x64xf32>
    %cst_137 = arith.constant 1.000000e+00 : f32
    %403 = vector.broadcast %cst_137 : f32 to vector<8x64xf32>
    %404 = arith.addf %403, %402 : vector<8x64xf32>
    %405 = arith.divf %403, %404 : vector<8x64xf32>
    %406 = vector.extract_strided_slice %393 {offsets = [0, 128], sizes = [8, 64], strides = [1, 1]} : vector<8x256xf32> to vector<8x64xf32>
    %407 = math.tanh %406 : vector<8x64xf32>
    %408 = vector.extract_strided_slice %393 {offsets = [0, 192], sizes = [8, 64], strides = [1, 1]} : vector<8x256xf32> to vector<8x64xf32>
    %409 = arith.negf %408 : vector<8x64xf32>
    %410 = math.exp %409 : vector<8x64xf32>
    %cst_138 = arith.constant 1.000000e+00 : f32
    %411 = vector.broadcast %cst_138 : f32 to vector<8x64xf32>
    %412 = arith.addf %411, %410 : vector<8x64xf32>
    %413 = arith.divf %411, %412 : vector<8x64xf32>
    %414 = arith.mulf %405, %382 : vector<8x64xf32>
    %415 = arith.mulf %399, %407 : vector<8x64xf32>
    %416 = arith.addf %414, %415 : vector<8x64xf32>
    %417 = math.tanh %416 : vector<8x64xf32>
    %418 = arith.mulf %413, %417 : vector<8x64xf32>
    %c2_i32 = arith.constant 2 : i32
    %419 = vector.broadcast %c2_i32 : i32 to vector<8x1xi32>
    %420 = arith.cmpi eq, %2, %419 : vector<8x1xi32>
    %421 = vector.shape_cast %420 : vector<8x1xi1> to vector<8x1xi1>
    %422 = vector.broadcast %421 : vector<8x1xi1> to vector<8x64xi1>
    %423 = arith.select %422, %418, %389 : vector<8x64xi1>, vector<8x64xf32>
    %c24_139 = arith.constant 24 : index
    %c0_140 = arith.constant 0 : index
    %424 = vector.load %arg11[%c24_139, %c0_140] : memref<80x256xf32, #tpu.memory_space<vmem>>, vector<8x256xf32>
    %c0_141 = arith.constant 0 : index
    %c0_142 = arith.constant 0 : index
    %425 = vector.load %arg6[%c0_141, %c0_142] : memref<64x256xf32, #tpu.memory_space<vmem>>, vector<64x256xf32>
    %cst_143 = arith.constant dense<0.000000e+00> : vector<8x256xf32>
    %426 = tpu.matmul %418, %425, %cst_143 {dimension_numbers = #tpu.dot_dimension_numbers<[1], [0], [0], [1], [0, 0, 1, 1], [], []>} : vector<8x64xf32>, vector<64x256xf32>, vector<8x256xf32> -> vector<8x256xf32>
    %427 = arith.addf %424, %426 : vector<8x256xf32>
    %428 = vector.extract_strided_slice %427 {offsets = [0, 0], sizes = [8, 64], strides = [1, 1]} : vector<8x256xf32> to vector<8x64xf32>
    %429 = arith.negf %428 : vector<8x64xf32>
    %430 = math.exp %429 : vector<8x64xf32>
    %cst_144 = arith.constant 1.000000e+00 : f32
    %431 = vector.broadcast %cst_144 : f32 to vector<8x64xf32>
    %432 = arith.addf %431, %430 : vector<8x64xf32>
    %433 = arith.divf %431, %432 : vector<8x64xf32>
    %434 = vector.extract_strided_slice %427 {offsets = [0, 64], sizes = [8, 64], strides = [1, 1]} : vector<8x256xf32> to vector<8x64xf32>
    %435 = arith.negf %434 : vector<8x64xf32>
    %436 = math.exp %435 : vector<8x64xf32>
    %cst_145 = arith.constant 1.000000e+00 : f32
    %437 = vector.broadcast %cst_145 : f32 to vector<8x64xf32>
    %438 = arith.addf %437, %436 : vector<8x64xf32>
    %439 = arith.divf %437, %438 : vector<8x64xf32>
    %440 = vector.extract_strided_slice %427 {offsets = [0, 128], sizes = [8, 64], strides = [1, 1]} : vector<8x256xf32> to vector<8x64xf32>
    %441 = math.tanh %440 : vector<8x64xf32>
    %442 = vector.extract_strided_slice %427 {offsets = [0, 192], sizes = [8, 64], strides = [1, 1]} : vector<8x256xf32> to vector<8x64xf32>
    %443 = arith.negf %442 : vector<8x64xf32>
    %444 = math.exp %443 : vector<8x64xf32>
    %cst_146 = arith.constant 1.000000e+00 : f32
    %445 = vector.broadcast %cst_146 : f32 to vector<8x64xf32>
    %446 = arith.addf %445, %444 : vector<8x64xf32>
    %447 = arith.divf %445, %446 : vector<8x64xf32>
    %448 = arith.mulf %439, %416 : vector<8x64xf32>
    %449 = arith.mulf %433, %441 : vector<8x64xf32>
    %450 = arith.addf %448, %449 : vector<8x64xf32>
    %451 = math.tanh %450 : vector<8x64xf32>
    %452 = arith.mulf %447, %451 : vector<8x64xf32>
    %c3_i32 = arith.constant 3 : i32
    %453 = vector.broadcast %c3_i32 : i32 to vector<8x1xi32>
    %454 = arith.cmpi eq, %2, %453 : vector<8x1xi32>
    %455 = vector.shape_cast %454 : vector<8x1xi1> to vector<8x1xi1>
    %456 = vector.broadcast %455 : vector<8x1xi1> to vector<8x64xi1>
    %457 = arith.select %456, %452, %423 : vector<8x64xi1>, vector<8x64xf32>
    %c32_147 = arith.constant 32 : index
    %c0_148 = arith.constant 0 : index
    %458 = vector.load %arg11[%c32_147, %c0_148] : memref<80x256xf32, #tpu.memory_space<vmem>>, vector<8x256xf32>
    %c0_149 = arith.constant 0 : index
    %c0_150 = arith.constant 0 : index
    %459 = vector.load %arg6[%c0_149, %c0_150] : memref<64x256xf32, #tpu.memory_space<vmem>>, vector<64x256xf32>
    %cst_151 = arith.constant dense<0.000000e+00> : vector<8x256xf32>
    %460 = tpu.matmul %452, %459, %cst_151 {dimension_numbers = #tpu.dot_dimension_numbers<[1], [0], [0], [1], [0, 0, 1, 1], [], []>} : vector<8x64xf32>, vector<64x256xf32>, vector<8x256xf32> -> vector<8x256xf32>
    %461 = arith.addf %458, %460 : vector<8x256xf32>
    %462 = vector.extract_strided_slice %461 {offsets = [0, 0], sizes = [8, 64], strides = [1, 1]} : vector<8x256xf32> to vector<8x64xf32>
    %463 = arith.negf %462 : vector<8x64xf32>
    %464 = math.exp %463 : vector<8x64xf32>
    %cst_152 = arith.constant 1.000000e+00 : f32
    %465 = vector.broadcast %cst_152 : f32 to vector<8x64xf32>
    %466 = arith.addf %465, %464 : vector<8x64xf32>
    %467 = arith.divf %465, %466 : vector<8x64xf32>
    %468 = vector.extract_strided_slice %461 {offsets = [0, 64], sizes = [8, 64], strides = [1, 1]} : vector<8x256xf32> to vector<8x64xf32>
    %469 = arith.negf %468 : vector<8x64xf32>
    %470 = math.exp %469 : vector<8x64xf32>
    %cst_153 = arith.constant 1.000000e+00 : f32
    %471 = vector.broadcast %cst_153 : f32 to vector<8x64xf32>
    %472 = arith.addf %471, %470 : vector<8x64xf32>
    %473 = arith.divf %471, %472 : vector<8x64xf32>
    %474 = vector.extract_strided_slice %461 {offsets = [0, 128], sizes = [8, 64], strides = [1, 1]} : vector<8x256xf32> to vector<8x64xf32>
    %475 = math.tanh %474 : vector<8x64xf32>
    %476 = vector.extract_strided_slice %461 {offsets = [0, 192], sizes = [8, 64], strides = [1, 1]} : vector<8x256xf32> to vector<8x64xf32>
    %477 = arith.negf %476 : vector<8x64xf32>
    %478 = math.exp %477 : vector<8x64xf32>
    %cst_154 = arith.constant 1.000000e+00 : f32
    %479 = vector.broadcast %cst_154 : f32 to vector<8x64xf32>
    %480 = arith.addf %479, %478 : vector<8x64xf32>
    %481 = arith.divf %479, %480 : vector<8x64xf32>
    %482 = arith.mulf %473, %450 : vector<8x64xf32>
    %483 = arith.mulf %467, %475 : vector<8x64xf32>
    %484 = arith.addf %482, %483 : vector<8x64xf32>
    %485 = math.tanh %484 : vector<8x64xf32>
    %486 = arith.mulf %481, %485 : vector<8x64xf32>
    %c4_i32 = arith.constant 4 : i32
    %487 = vector.broadcast %c4_i32 : i32 to vector<8x1xi32>
    %488 = arith.cmpi eq, %2, %487 : vector<8x1xi32>
    %489 = vector.shape_cast %488 : vector<8x1xi1> to vector<8x1xi1>
    %490 = vector.broadcast %489 : vector<8x1xi1> to vector<8x64xi1>
    %491 = arith.select %490, %486, %457 : vector<8x64xi1>, vector<8x64xf32>
    %c40_155 = arith.constant 40 : index
    %c0_156 = arith.constant 0 : index
    %492 = vector.load %arg11[%c40_155, %c0_156] : memref<80x256xf32, #tpu.memory_space<vmem>>, vector<8x256xf32>
    %c0_157 = arith.constant 0 : index
    %c0_158 = arith.constant 0 : index
    %493 = vector.load %arg6[%c0_157, %c0_158] : memref<64x256xf32, #tpu.memory_space<vmem>>, vector<64x256xf32>
    %cst_159 = arith.constant dense<0.000000e+00> : vector<8x256xf32>
    %494 = tpu.matmul %486, %493, %cst_159 {dimension_numbers = #tpu.dot_dimension_numbers<[1], [0], [0], [1], [0, 0, 1, 1], [], []>} : vector<8x64xf32>, vector<64x256xf32>, vector<8x256xf32> -> vector<8x256xf32>
    %495 = arith.addf %492, %494 : vector<8x256xf32>
    %496 = vector.extract_strided_slice %495 {offsets = [0, 0], sizes = [8, 64], strides = [1, 1]} : vector<8x256xf32> to vector<8x64xf32>
    %497 = arith.negf %496 : vector<8x64xf32>
    %498 = math.exp %497 : vector<8x64xf32>
    %cst_160 = arith.constant 1.000000e+00 : f32
    %499 = vector.broadcast %cst_160 : f32 to vector<8x64xf32>
    %500 = arith.addf %499, %498 : vector<8x64xf32>
    %501 = arith.divf %499, %500 : vector<8x64xf32>
    %502 = vector.extract_strided_slice %495 {offsets = [0, 64], sizes = [8, 64], strides = [1, 1]} : vector<8x256xf32> to vector<8x64xf32>
    %503 = arith.negf %502 : vector<8x64xf32>
    %504 = math.exp %503 : vector<8x64xf32>
    %cst_161 = arith.constant 1.000000e+00 : f32
    %505 = vector.broadcast %cst_161 : f32 to vector<8x64xf32>
    %506 = arith.addf %505, %504 : vector<8x64xf32>
    %507 = arith.divf %505, %506 : vector<8x64xf32>
    %508 = vector.extract_strided_slice %495 {offsets = [0, 128], sizes = [8, 64], strides = [1, 1]} : vector<8x256xf32> to vector<8x64xf32>
    %509 = math.tanh %508 : vector<8x64xf32>
    %510 = vector.extract_strided_slice %495 {offsets = [0, 192], sizes = [8, 64], strides = [1, 1]} : vector<8x256xf32> to vector<8x64xf32>
    %511 = arith.negf %510 : vector<8x64xf32>
    %512 = math.exp %511 : vector<8x64xf32>
    %cst_162 = arith.constant 1.000000e+00 : f32
    %513 = vector.broadcast %cst_162 : f32 to vector<8x64xf32>
    %514 = arith.addf %513, %512 : vector<8x64xf32>
    %515 = arith.divf %513, %514 : vector<8x64xf32>
    %516 = arith.mulf %507, %484 : vector<8x64xf32>
    %517 = arith.mulf %501, %509 : vector<8x64xf32>
    %518 = arith.addf %516, %517 : vector<8x64xf32>
    %519 = math.tanh %518 : vector<8x64xf32>
    %520 = arith.mulf %515, %519 : vector<8x64xf32>
    %c5_i32 = arith.constant 5 : i32
    %521 = vector.broadcast %c5_i32 : i32 to vector<8x1xi32>
    %522 = arith.cmpi eq, %2, %521 : vector<8x1xi32>
    %523 = vector.shape_cast %522 : vector<8x1xi1> to vector<8x1xi1>
    %524 = vector.broadcast %523 : vector<8x1xi1> to vector<8x64xi1>
    %525 = arith.select %524, %520, %491 : vector<8x64xi1>, vector<8x64xf32>
    %c48_163 = arith.constant 48 : index
    %c0_164 = arith.constant 0 : index
    %526 = vector.load %arg11[%c48_163, %c0_164] : memref<80x256xf32, #tpu.memory_space<vmem>>, vector<8x256xf32>
    %c0_165 = arith.constant 0 : index
    %c0_166 = arith.constant 0 : index
    %527 = vector.load %arg6[%c0_165, %c0_166] : memref<64x256xf32, #tpu.memory_space<vmem>>, vector<64x256xf32>
    %cst_167 = arith.constant dense<0.000000e+00> : vector<8x256xf32>
    %528 = tpu.matmul %520, %527, %cst_167 {dimension_numbers = #tpu.dot_dimension_numbers<[1], [0], [0], [1], [0, 0, 1, 1], [], []>} : vector<8x64xf32>, vector<64x256xf32>, vector<8x256xf32> -> vector<8x256xf32>
    %529 = arith.addf %526, %528 : vector<8x256xf32>
    %530 = vector.extract_strided_slice %529 {offsets = [0, 0], sizes = [8, 64], strides = [1, 1]} : vector<8x256xf32> to vector<8x64xf32>
    %531 = arith.negf %530 : vector<8x64xf32>
    %532 = math.exp %531 : vector<8x64xf32>
    %cst_168 = arith.constant 1.000000e+00 : f32
    %533 = vector.broadcast %cst_168 : f32 to vector<8x64xf32>
    %534 = arith.addf %533, %532 : vector<8x64xf32>
    %535 = arith.divf %533, %534 : vector<8x64xf32>
    %536 = vector.extract_strided_slice %529 {offsets = [0, 64], sizes = [8, 64], strides = [1, 1]} : vector<8x256xf32> to vector<8x64xf32>
    %537 = arith.negf %536 : vector<8x64xf32>
    %538 = math.exp %537 : vector<8x64xf32>
    %cst_169 = arith.constant 1.000000e+00 : f32
    %539 = vector.broadcast %cst_169 : f32 to vector<8x64xf32>
    %540 = arith.addf %539, %538 : vector<8x64xf32>
    %541 = arith.divf %539, %540 : vector<8x64xf32>
    %542 = vector.extract_strided_slice %529 {offsets = [0, 128], sizes = [8, 64], strides = [1, 1]} : vector<8x256xf32> to vector<8x64xf32>
    %543 = math.tanh %542 : vector<8x64xf32>
    %544 = vector.extract_strided_slice %529 {offsets = [0, 192], sizes = [8, 64], strides = [1, 1]} : vector<8x256xf32> to vector<8x64xf32>
    %545 = arith.negf %544 : vector<8x64xf32>
    %546 = math.exp %545 : vector<8x64xf32>
    %cst_170 = arith.constant 1.000000e+00 : f32
    %547 = vector.broadcast %cst_170 : f32 to vector<8x64xf32>
    %548 = arith.addf %547, %546 : vector<8x64xf32>
    %549 = arith.divf %547, %548 : vector<8x64xf32>
    %550 = arith.mulf %541, %518 : vector<8x64xf32>
    %551 = arith.mulf %535, %543 : vector<8x64xf32>
    %552 = arith.addf %550, %551 : vector<8x64xf32>
    %553 = math.tanh %552 : vector<8x64xf32>
    %554 = arith.mulf %549, %553 : vector<8x64xf32>
    %c6_i32 = arith.constant 6 : i32
    %555 = vector.broadcast %c6_i32 : i32 to vector<8x1xi32>
    %556 = arith.cmpi eq, %2, %555 : vector<8x1xi32>
    %557 = vector.shape_cast %556 : vector<8x1xi1> to vector<8x1xi1>
    %558 = vector.broadcast %557 : vector<8x1xi1> to vector<8x64xi1>
    %559 = arith.select %558, %554, %525 : vector<8x64xi1>, vector<8x64xf32>
    %c56_171 = arith.constant 56 : index
    %c0_172 = arith.constant 0 : index
    %560 = vector.load %arg11[%c56_171, %c0_172] : memref<80x256xf32, #tpu.memory_space<vmem>>, vector<8x256xf32>
    %c0_173 = arith.constant 0 : index
    %c0_174 = arith.constant 0 : index
    %561 = vector.load %arg6[%c0_173, %c0_174] : memref<64x256xf32, #tpu.memory_space<vmem>>, vector<64x256xf32>
    %cst_175 = arith.constant dense<0.000000e+00> : vector<8x256xf32>
    %562 = tpu.matmul %554, %561, %cst_175 {dimension_numbers = #tpu.dot_dimension_numbers<[1], [0], [0], [1], [0, 0, 1, 1], [], []>} : vector<8x64xf32>, vector<64x256xf32>, vector<8x256xf32> -> vector<8x256xf32>
    %563 = arith.addf %560, %562 : vector<8x256xf32>
    %564 = vector.extract_strided_slice %563 {offsets = [0, 0], sizes = [8, 64], strides = [1, 1]} : vector<8x256xf32> to vector<8x64xf32>
    %565 = arith.negf %564 : vector<8x64xf32>
    %566 = math.exp %565 : vector<8x64xf32>
    %cst_176 = arith.constant 1.000000e+00 : f32
    %567 = vector.broadcast %cst_176 : f32 to vector<8x64xf32>
    %568 = arith.addf %567, %566 : vector<8x64xf32>
    %569 = arith.divf %567, %568 : vector<8x64xf32>
    %570 = vector.extract_strided_slice %563 {offsets = [0, 64], sizes = [8, 64], strides = [1, 1]} : vector<8x256xf32> to vector<8x64xf32>
    %571 = arith.negf %570 : vector<8x64xf32>
    %572 = math.exp %571 : vector<8x64xf32>
    %cst_177 = arith.constant 1.000000e+00 : f32
    %573 = vector.broadcast %cst_177 : f32 to vector<8x64xf32>
    %574 = arith.addf %573, %572 : vector<8x64xf32>
    %575 = arith.divf %573, %574 : vector<8x64xf32>
    %576 = vector.extract_strided_slice %563 {offsets = [0, 128], sizes = [8, 64], strides = [1, 1]} : vector<8x256xf32> to vector<8x64xf32>
    %577 = math.tanh %576 : vector<8x64xf32>
    %578 = vector.extract_strided_slice %563 {offsets = [0, 192], sizes = [8, 64], strides = [1, 1]} : vector<8x256xf32> to vector<8x64xf32>
    %579 = arith.negf %578 : vector<8x64xf32>
    %580 = math.exp %579 : vector<8x64xf32>
    %cst_178 = arith.constant 1.000000e+00 : f32
    %581 = vector.broadcast %cst_178 : f32 to vector<8x64xf32>
    %582 = arith.addf %581, %580 : vector<8x64xf32>
    %583 = arith.divf %581, %582 : vector<8x64xf32>
    %584 = arith.mulf %575, %552 : vector<8x64xf32>
    %585 = arith.mulf %569, %577 : vector<8x64xf32>
    %586 = arith.addf %584, %585 : vector<8x64xf32>
    %587 = math.tanh %586 : vector<8x64xf32>
    %588 = arith.mulf %583, %587 : vector<8x64xf32>
    %c7_i32 = arith.constant 7 : i32
    %589 = vector.broadcast %c7_i32 : i32 to vector<8x1xi32>
    %590 = arith.cmpi eq, %2, %589 : vector<8x1xi32>
    %591 = vector.shape_cast %590 : vector<8x1xi1> to vector<8x1xi1>
    %592 = vector.broadcast %591 : vector<8x1xi1> to vector<8x64xi1>
    %593 = arith.select %592, %588, %559 : vector<8x64xi1>, vector<8x64xf32>
    %c64_179 = arith.constant 64 : index
    %c0_180 = arith.constant 0 : index
    %594 = vector.load %arg11[%c64_179, %c0_180] : memref<80x256xf32, #tpu.memory_space<vmem>>, vector<8x256xf32>
    %c0_181 = arith.constant 0 : index
    %c0_182 = arith.constant 0 : index
    %595 = vector.load %arg6[%c0_181, %c0_182] : memref<64x256xf32, #tpu.memory_space<vmem>>, vector<64x256xf32>
    %cst_183 = arith.constant dense<0.000000e+00> : vector<8x256xf32>
    %596 = tpu.matmul %588, %595, %cst_183 {dimension_numbers = #tpu.dot_dimension_numbers<[1], [0], [0], [1], [0, 0, 1, 1], [], []>} : vector<8x64xf32>, vector<64x256xf32>, vector<8x256xf32> -> vector<8x256xf32>
    %597 = arith.addf %594, %596 : vector<8x256xf32>
    %598 = vector.extract_strided_slice %597 {offsets = [0, 0], sizes = [8, 64], strides = [1, 1]} : vector<8x256xf32> to vector<8x64xf32>
    %599 = arith.negf %598 : vector<8x64xf32>
    %600 = math.exp %599 : vector<8x64xf32>
    %cst_184 = arith.constant 1.000000e+00 : f32
    %601 = vector.broadcast %cst_184 : f32 to vector<8x64xf32>
    %602 = arith.addf %601, %600 : vector<8x64xf32>
    %603 = arith.divf %601, %602 : vector<8x64xf32>
    %604 = vector.extract_strided_slice %597 {offsets = [0, 64], sizes = [8, 64], strides = [1, 1]} : vector<8x256xf32> to vector<8x64xf32>
    %605 = arith.negf %604 : vector<8x64xf32>
    %606 = math.exp %605 : vector<8x64xf32>
    %cst_185 = arith.constant 1.000000e+00 : f32
    %607 = vector.broadcast %cst_185 : f32 to vector<8x64xf32>
    %608 = arith.addf %607, %606 : vector<8x64xf32>
    %609 = arith.divf %607, %608 : vector<8x64xf32>
    %610 = vector.extract_strided_slice %597 {offsets = [0, 128], sizes = [8, 64], strides = [1, 1]} : vector<8x256xf32> to vector<8x64xf32>
    %611 = math.tanh %610 : vector<8x64xf32>
    %612 = vector.extract_strided_slice %597 {offsets = [0, 192], sizes = [8, 64], strides = [1, 1]} : vector<8x256xf32> to vector<8x64xf32>
    %613 = arith.negf %612 : vector<8x64xf32>
    %614 = math.exp %613 : vector<8x64xf32>
    %cst_186 = arith.constant 1.000000e+00 : f32
    %615 = vector.broadcast %cst_186 : f32 to vector<8x64xf32>
    %616 = arith.addf %615, %614 : vector<8x64xf32>
    %617 = arith.divf %615, %616 : vector<8x64xf32>
    %618 = arith.mulf %609, %586 : vector<8x64xf32>
    %619 = arith.mulf %603, %611 : vector<8x64xf32>
    %620 = arith.addf %618, %619 : vector<8x64xf32>
    %621 = math.tanh %620 : vector<8x64xf32>
    %622 = arith.mulf %617, %621 : vector<8x64xf32>
    %c8_i32 = arith.constant 8 : i32
    %623 = vector.broadcast %c8_i32 : i32 to vector<8x1xi32>
    %624 = arith.cmpi eq, %2, %623 : vector<8x1xi32>
    %625 = vector.shape_cast %624 : vector<8x1xi1> to vector<8x1xi1>
    %626 = vector.broadcast %625 : vector<8x1xi1> to vector<8x64xi1>
    %627 = arith.select %626, %622, %593 : vector<8x64xi1>, vector<8x64xf32>
    %c72_187 = arith.constant 72 : index
    %c0_188 = arith.constant 0 : index
    %628 = vector.load %arg11[%c72_187, %c0_188] : memref<80x256xf32, #tpu.memory_space<vmem>>, vector<8x256xf32>
    %c0_189 = arith.constant 0 : index
    %c0_190 = arith.constant 0 : index
    %629 = vector.load %arg6[%c0_189, %c0_190] : memref<64x256xf32, #tpu.memory_space<vmem>>, vector<64x256xf32>
    %cst_191 = arith.constant dense<0.000000e+00> : vector<8x256xf32>
    %630 = tpu.matmul %622, %629, %cst_191 {dimension_numbers = #tpu.dot_dimension_numbers<[1], [0], [0], [1], [0, 0, 1, 1], [], []>} : vector<8x64xf32>, vector<64x256xf32>, vector<8x256xf32> -> vector<8x256xf32>
    %631 = arith.addf %628, %630 : vector<8x256xf32>
    %632 = vector.extract_strided_slice %631 {offsets = [0, 0], sizes = [8, 64], strides = [1, 1]} : vector<8x256xf32> to vector<8x64xf32>
    %633 = arith.negf %632 : vector<8x64xf32>
    %634 = math.exp %633 : vector<8x64xf32>
    %cst_192 = arith.constant 1.000000e+00 : f32
    %635 = vector.broadcast %cst_192 : f32 to vector<8x64xf32>
    %636 = arith.addf %635, %634 : vector<8x64xf32>
    %637 = arith.divf %635, %636 : vector<8x64xf32>
    %638 = vector.extract_strided_slice %631 {offsets = [0, 64], sizes = [8, 64], strides = [1, 1]} : vector<8x256xf32> to vector<8x64xf32>
    %639 = arith.negf %638 : vector<8x64xf32>
    %640 = math.exp %639 : vector<8x64xf32>
    %cst_193 = arith.constant 1.000000e+00 : f32
    %641 = vector.broadcast %cst_193 : f32 to vector<8x64xf32>
    %642 = arith.addf %641, %640 : vector<8x64xf32>
    %643 = arith.divf %641, %642 : vector<8x64xf32>
    %644 = vector.extract_strided_slice %631 {offsets = [0, 128], sizes = [8, 64], strides = [1, 1]} : vector<8x256xf32> to vector<8x64xf32>
    %645 = math.tanh %644 : vector<8x64xf32>
    %646 = vector.extract_strided_slice %631 {offsets = [0, 192], sizes = [8, 64], strides = [1, 1]} : vector<8x256xf32> to vector<8x64xf32>
    %647 = arith.negf %646 : vector<8x64xf32>
    %648 = math.exp %647 : vector<8x64xf32>
    %cst_194 = arith.constant 1.000000e+00 : f32
    %649 = vector.broadcast %cst_194 : f32 to vector<8x64xf32>
    %650 = arith.addf %649, %648 : vector<8x64xf32>
    %651 = arith.divf %649, %650 : vector<8x64xf32>
    %652 = arith.mulf %643, %620 : vector<8x64xf32>
    %653 = arith.mulf %637, %645 : vector<8x64xf32>
    %654 = arith.addf %652, %653 : vector<8x64xf32>
    %655 = math.tanh %654 : vector<8x64xf32>
    %656 = arith.mulf %651, %655 : vector<8x64xf32>
    %c9_i32 = arith.constant 9 : i32
    %657 = vector.broadcast %c9_i32 : i32 to vector<8x1xi32>
    %658 = arith.cmpi eq, %2, %657 : vector<8x1xi32>
    %659 = vector.shape_cast %658 : vector<8x1xi1> to vector<8x1xi1>
    %660 = vector.broadcast %659 : vector<8x1xi1> to vector<8x64xi1>
    %661 = arith.select %660, %656, %627 : vector<8x64xi1>, vector<8x64xf32>
    %c0_195 = arith.constant 0 : index
    %c0_196 = arith.constant 0 : index
    %662 = vector.load %arg8[%c0_195, %c0_196] : memref<64x5xf32, #tpu.memory_space<vmem>>, vector<64x5xf32>
    %cst_197 = arith.constant dense<0.000000e+00> : vector<8x5xf32>
    %663 = tpu.matmul %661, %662, %cst_197 {dimension_numbers = #tpu.dot_dimension_numbers<[1], [0], [0], [1], [0, 0, 1, 1], [], []>} : vector<8x64xf32>, vector<64x5xf32>, vector<8x5xf32> -> vector<8x5xf32>
    %c0_198 = arith.constant 0 : index
    %c0_199 = arith.constant 0 : index
    %664 = vector.load %arg9[%c0_198, %c0_199] : memref<1x5xf32, #tpu.memory_space<vmem>>, vector<1x5xf32>
    %665 = vector.broadcast %664 : vector<1x5xf32> to vector<8x5xf32>
    %666 = arith.addf %663, %665 : vector<8x5xf32>
    %c0_200 = arith.constant 0 : index
    %c0_201 = arith.constant 0 : index
    %667 = vector.load %arg10[%c0_200, %c0_201] : memref<8x5xf32, #tpu.memory_space<vmem>>, vector<8x5xf32>
    tpu.vector_store %arg10[%c0_200, %c0_201], %666 {strides = array<i32>} : memref<8x5xf32, #tpu.memory_space<vmem>>, vector<8x5xf32>,
    return
  }
}

</mosaic_0001>

<bundles_post_ra>
// kernel: lstm_per_hand_forward.1
= control target key start
LH: loop header
LB: loop body
LE: loop exit
PB: predicated region body
PF: predicated region fallthrough
CT: control target
= control target key end

     0   :  { %15 = vsyncpa [#allocation5], 0  ;;  %s4422_s0 = inlined_call_operand.vmem [shape: f32[80,16], index: 0, kind: input, shape index: {}]   ;;  %s4423_s1 = inlined_call_operand.vmem [shape: s32[8,1], index: 1, kind: input, shape index: {}]   ;;  %s4424_s2 = inlined_call_operand.vmem [shape: f32[16,256], index: 2, kind: input, shape index: {}]   ;;  %s4425_s3 = inlined_call_operand.vmem [shape: f32[64,256], index: 3, kind: input, shape index: {}]   ;;  %s4426_s4 = inlined_call_operand.vmem [shape: f32[1,256], index: 4, kind: input, shape index: {}]   ;;  %s4427_s5 = inlined_call_operand.hbm [shape: f32[64,256], index: 5, kind: input, shape index: {}]   ;;  %s4428_s6 = inlined_call_operand.hbm [shape: f32[64,256], index: 6, kind: input, shape index: {}]   ;;  %s4429_s7 = inlined_call_operand.vmem [shape: f32[1,256], index: 7, kind: input, shape index: {}]   ;;  %s4430_s8 = inlined_call_operand.vmem [shape: f32[64,5], index: 8, kind: input, shape index: {}]   ;;  %s4431_s9 = inlined_call_operand.vmem [shape: f32[1,5], index: 9, kind: input, shape index: {}]   ;;  %s4432_s10 = inlined_call_operand.vmem [shape: f32[8,5], index: 10, kind: output, shape index: {}]  }
   0x1   :  { %16 = vsyncpa [#allocation7], 0  ;;  %s3721_s13 = smov [#allocation4]   ;;  %s3673_s17 = scalar_lea.hbm %s4427_s5, 2048 }
   0x2   :  { %s32_s14 = sshll.u32 %s3721_s13, 4  ;;  %p3674_p0 = scmp.ne.s32.totalorder %s4427_s5, %s3673_s17  ;;  %s33_s14 = int_to_ptr.vmem [resolvable:$true] %s32_s14 }
   0x3   :  { %p3677_p1 = scmp.lt.u32.totalorder %s3673_s17, %s4427_s5 }
   0x5   :  { %p3679_p2 = pnand %p3677_p1, %p3674_p0 }
   0x7   :  { %3682 = shalt.err (!%p3679_p2)
}
   0x8   :  { %s3683_s22 = scalar_lea.vmem %s33_s14, 2048  ;;  %p3688_p4 = scmp.lt.s32.totalorder %s33_s14, %s33_s14 }
   0x9   :  { %p3684_p3 = scmp.ne.s32.totalorder %s33_s14, %s3683_s22  ;;  %p3689_p5 = scmp.lt.s32.totalorder %s3683_s22, %s3683_s22 }
   0xb   :  { %p3690_p6 = por %p3689_p5, %p3688_p4 }
   0xd   :  { %p3691_p7 = pnand %p3690_p6, %p3684_p3 }
   0xf   :  { %3694 = shalt.err (!%p3691_p7)
}
  0x10   :  { %s3722_s23 = smov 256   ;;  %s3723_s24 = smov 16  }
  0x11   :  { %38 = dma.hbm_to_vmem [thread:$0]  %s4427_s5, 2048, %s33_s14, [#allocation5], %s3722_s23, %s3722_s23, %s3723_s24  }
  0x12   :  { %s3724_s27 = smov [#allocation6]   ;;  %s3695_s11 = scalar_lea.hbm %s4428_s6, 2048 }
  0x13   :  { %s44_s28 = sshll.u32 %s3724_s27, 4  ;;  %p3696_p8 = scmp.ne.s32.totalorder %s4428_s6, %s3695_s11  ;;  %s45_s28 = int_to_ptr.vmem [resolvable:$true] %s44_s28 }
  0x14   :  { %p3699_p9 = scmp.lt.u32.totalorder %s3695_s11, %s4428_s6 }
  0x16   :  { %p3701_p10 = pnand %p3699_p9, %p3696_p8 }
  0x18   :  { %3704 = shalt.err (!%p3701_p10)
}
  0x19   :  { %s3705_s17 = scalar_lea.vmem %s45_s28, 2048  ;;  %p3710_p12 = scmp.lt.s32.totalorder %s45_s28, %s45_s28 }
  0x1a   :  { %p3706_p11 = scmp.ne.s32.totalorder %s45_s28, %s3705_s17  ;;  %p3711_p13 = scmp.lt.s32.totalorder %s3705_s17, %s3705_s17 }
  0x1c   :  { %p3712_p0 = por %p3711_p13, %p3710_p12 }
  0x1e   :  { %p3713_p1 = pnand %p3712_p0, %p3706_p11 }
  0x20   :  { %3716 = shalt.err (!%p3713_p1)
}
  0x21   :  { %50 = dma.hbm_to_vmem [thread:$0]  %s4428_s6, 2048, %s45_s28, [#allocation7], %s3722_s23, %s3722_s23, %s3723_s24  }
  0x22   :  { %3717 = dma.done.wait [#allocation5], 2048  }
  0x23   :  { %3718 = vsyncadd [#allocation5], 4294965248 }
  0x24   :  { %3719 = dma.done.wait [#allocation7], 2048  }
  0x25   :  { %3720 = vsyncadd [#allocation7], 4294965248  ;;  %v3725_v0 = vmov 0.0   ;;  %v76_v1 = vld [vmem:[%s4424_s2 + $0x8] sm:$0xff]  ;;  %v78_v2 = vld [vmem:[%s4424_s2 + $0x18] sm:$0xff]  ;;  %vm91_vm0 = vcmask 130048   ;;  %v81_v41 = vlaneseq }
  0x26   :  { %186 = vmatprep.mubr.f32.mxu0 %v3725_v0  ;;  %1601 = vmatprep.mubr.f32.mxu1 %v3725_v0  ;;  %v75_v3 = vld [vmem:[%s4424_s2] sm:$0xff]  ;;  %v2990_v4 = vpack.c.bf16 %v78_v2, %v76_v1  ;;  %v77_v5 = vld [vmem:[%s4424_s2 + $0x10] sm:$0xff]  ;;  %v270_v6 = vld [vmem:[%s4425_s3 + $0x8] sm:$0xff]  ;;  %vm285_vm1 = vcmask 523264   ;;  %vm3729_vm12 = vmmov 0  }
  0x27   :  { %v2992_v7 = vpack.c.bf16 %v77_v5, %v75_v3  ;;  %v272_v8 = vld [vmem:[%s4425_s3 + $0x18] sm:$0xff]  ;;  %v269_v9 = vld [vmem:[%s4425_s3] sm:$0xff]  ;;  %v271_v10 = vld [vmem:[%s4425_s3 + $0x10] sm:$0xff]  ;;  %v3956_v42 = vshrl.u32 %v81_v41, 7 }
  0x28   :  { %2991 = vmatprep.subr.bf16.mxu0 %v2990_v4  ;;  %v3835_v11 = vpack.c.bf16 %v272_v8, %v270_v6  ;;  %v274_v12 = vld [vmem:[%s4425_s3 + $0x28] sm:$0xff]  ;;  %v65_v13 = vld [vmem:[%s4422_s0] sm:$0xff]  ;;  %v3843_v14 = vpack.c.bf16 %v271_v10, %v269_v9  ;;  %v276_v15 = vld [vmem:[%s4425_s3 + $0x38] sm:$0xff] }
  0x29   :  { %2993 = vmatpush1.bf16.msra.mxu0 %v2992_v7  ;;  %v3849_v16 = vpack.c.bf16 %v276_v15, %v274_v12  ;;  %v273_v17 = vld [vmem:[%s4425_s3 + $0x20] sm:$0xff]  ;;  %v275_v18 = vld [vmem:[%s4425_s3 + $0x30] sm:$0xff]  ;;  %v278_v19 = vld [vmem:[%s4425_s3 + $0x48] sm:$0xff]  ;;  %v83_v43 = vsub.s32 0, %v3956_v42  ;;  %v87_v50 = vsub.s32 1, %v3956_v42 }
  0x2a   :  { %2995 = vmatprep.subr.bf16.mxu0 %v3835_v11  ;;  %v280_v20 = vld [vmem:[%s4425_s3 + $0x58] sm:$0xff]  ;;  %v66_v21 = vld [vmem:[%s4422_s0 + $0x8] sm:$0xff]  ;;  %v3869_v22 = vpack.c.bf16 %v275_v18, %v273_v17  ;;  %v277_v24 = vld [vmem:[%s4425_s3 + $0x40] sm:$0xff] }
  0x2b   :  { %v3872_v23 = vpack.c.bf16 %v280_v20, %v278_v19  ;;  %v279_v25 = vld [vmem:[%s4425_s3 + $0x50] sm:$0xff]  ;;  %v282_v26 = vld [vmem:[%s4425_s3 + $0x68] sm:$0xff]  ;;  %v284_v27 = vld [vmem:[%s4425_s3 + $0x78] sm:$0xff] }
  0x2c   :  { %2882 = vmatmul.mubr.msk.f32.vlgmr.msra.gmra.mrb[0].mxu0 %vm91_vm0, %v65_v13  ;;  %v67_v28 = vld [vmem:[%s4422_s0 + $0x10] sm:$0xff]  ;;  %v3892_v29 = vpack.c.bf16 %v279_v25, %v277_v24  ;;  %v3895_v30 = vpack.c.bf16 %v284_v27, %v282_v26  ;;  %v281_v31 = vld [vmem:[%s4425_s3 + $0x60] sm:$0xff]  ;;  %v68_v33 = vld [vmem:[%s4422_s0 + $0x18] sm:$0xff] }
  0x2d   :  { %2997 = vmatpush1.bf16.msra.mxu0 %v3843_v14  ;;  %192 = vmatprep.mubr.f32.mxu0 %v3725_v0  ;;  %v283_v32 = vld [vmem:[%s4425_s3 + $0x70] sm:$0xff]  ;;  %v69_v35 = vld [vmem:[%s4422_s0 + $0x20] sm:$0xff]  ;;  %v70_v36 = vld [vmem:[%s4422_s0 + $0x28] sm:$0xff] }
  0x2e   :  { %2999 = vmatprep.subr.bf16.mxu0 %v3849_v16  ;;  %v3909_v34 = vpack.c.bf16 %v283_v32, %v281_v31  ;;  %v71_v37 = vld [vmem:[%s4422_s0 + $0x30] sm:$0xff]  ;;  %v72_v38 = vld [vmem:[%s4422_s0 + $0x38] sm:$0xff]  ;;  %v73_v39 = vld [vmem:[%s4422_s0 + $0x40] sm:$0xff] }
  0x2f   :  { %v74_v40 = vld [vmem:[%s4422_s0 + $0x48] sm:$0xff]  ;;  %v79_v44 = vld [vmem:[%s4426_s4] sm:$0x3]  ;;  %s3726_s4 = smov 64   ;;  %v1480_v58 = vld [vmem:[#allocation4 + $0x8] sm:$0xff] }
  0x30   :  { %2883 = vmatmul.mubr.msk.f32.gmra.mrb[2].mxu0 %vm91_vm0, %v66_v21  ;;  %v3964_v45 = vrot.slane %v79_v44, %v83_v43  ;;  %v3970_v51 = vrot.slane %v79_v44, %v87_v50  ;;  %v1482_v59 = vld [vmem:[#allocation4 + $0x18] sm:$0xff]  ;;  %v1479_v60 = vld [vmem:[#allocation4] sm:$0xff]  ;;  %v1481_v62 = vld [vmem:[#allocation4 + $0x10] sm:$0xff] }
  0x31   :  { %198 = vmatprep.mubr.f32.mxu0 %v3725_v0  ;;  %3001 = vmatpush1.bf16.msra.mxu0 %v3869_v22  ;;  %v3154_v61 = vpack.c.bf16 %v1482_v59, %v1480_v58  ;;  %v1484_v63 = vld [vmem:[#allocation4 + $0x28] sm:$0xff]  ;;  %v1486_v1 = vld [vmem:[#allocation4 + $0x38] sm:$0xff]  ;;  %v3156_v2 = vpack.c.bf16 %v1481_v62, %v1479_v60  ;;  %v1483_v4 = vld [vmem:[#allocation4 + $0x20] sm:$0xff] }
  0x32   :  { %3003 = vmatprep.subr.bf16.mxu0 %v3872_v23  ;;  %v3158_v3 = vpack.c.bf16 %v1486_v1, %v1484_v63  ;;  %v1485_v5 = vld [vmem:[#allocation4 + $0x30] sm:$0xff]  ;;  %v1488_v13 = vld [vmem:[#allocation4 + $0x48] sm:$0xff]  ;;  %v1490_v15 = vld [vmem:[#allocation4 + $0x58] sm:$0xff] }
  0x33   :  { %3155 = vmatprep.subr.bf16.mxu1 %v3154_v61  ;;  %v3160_v6 = vpack.c.bf16 %v1485_v5, %v1483_v4  ;;  %v3162_v18 = vpack.c.bf16 %v1490_v15, %v1488_v13  ;;  %v1487_v19 = vld [vmem:[#allocation4 + $0x40] sm:$0xff]  ;;  %v1489_v20 = vld [vmem:[#allocation4 + $0x50] sm:$0xff]  ;;  %v1492_v24 = vld [vmem:[#allocation4 + $0x68] sm:$0xff] }
  0x34   :  { %2884 = vmatmul.mubr.msk.f32.gmra.mrb[4].mxu0 %vm91_vm0, %v67_v28  ;;  %3157 = vmatpush1.bf16.msra.mxu1 %v3156_v2  ;;  %v3164_v21 = vpack.c.bf16 %v1489_v20, %v1487_v19  ;;  %v1494_v25 = vld [vmem:[#allocation4 + $0x78] sm:$0xff]  ;;  %v1491_v26 = vld [vmem:[#allocation4 + $0x60] sm:$0xff]  ;;  %v1493_v28 = vld [vmem:[#allocation4 + $0x70] sm:$0xff] }
  0x35   :  { %204 = vmatprep.mubr.f32.mxu0 %v3725_v0  ;;  %3005 = vmatpush1.bf16.msra.mxu0 %v3892_v29  ;;  %v3166_v27 = vpack.c.bf16 %v1494_v25, %v1492_v24  ;;  %v3168_v31 = vpack.c.bf16 %v1493_v28, %v1491_v26 }
  0x36   :  { %3007 = vmatprep.subr.bf16.mxu0 %v3895_v30  ;;  %3159 = vmatprep.subr.bf16.mxu1 %v3158_v3 }
  0x38   :  { %2885 = vmatmul.mubr.msk.f32.gmra.mrb[6].mxu0 %vm91_vm0, %v68_v33  ;;  %3161 = vmatpush1.bf16.msra.mxu1 %v3160_v6 }
  0x39   :  { %210 = vmatprep.mubr.f32.mxu0 %v3725_v0  ;;  %3009 = vmatpush1.bf16.msra.mxu0 %v3909_v34 }
  0x3a   :  { %3011 = vmatprep.subr.bf16.mxu0 %v3835_v11  ;;  %3163 = vmatprep.subr.bf16.mxu1 %v3162_v18 }
  0x3c   :  { %2886 = vmatmul.mubr.msk.f32.gmra.mrb[8].mxu0 %vm91_vm0, %v69_v35  ;;  %3165 = vmatpush1.bf16.msra.mxu1 %v3164_v21 }
  0x3d   :  { %216 = vmatprep.mubr.f32.mxu0 %v3725_v0  ;;  %3167 = vmatprep.subr.bf16.mxu1 %v3166_v27 }
  0x40   :  { %2887 = vmatmul.mubr.msk.f32.gmra.mrb[10].mxu0 %vm91_vm0, %v70_v36  ;;  %3169 = vmatpush1.bf16.msra.mxu1 %v3168_v31 }
  0x41   :  { %222 = vmatprep.mubr.f32.mxu0 %v3725_v0 }
  0x44   :  { %2888 = vmatmul.mubr.msk.f32.gmra.mrb[12].mxu0 %vm91_vm0, %v71_v37 }
  0x45   :  { %228 = vmatprep.mubr.f32.mxu0 %v3725_v0 }
  0x48   :  { %2889 = vmatmul.mubr.msk.f32.gmra.mrb[14].mxu0 %vm91_vm0, %v72_v38 }
  0x49   :  { %234 = vmatprep.mubr.f32.mxu0 %v3725_v0 }
  0x4c   :  { %2890 = vmatmul.mubr.msk.f32.gmra.mrb[16].mxu0 %vm91_vm0, %v73_v39 }
  0x4d   :  { %240 = vmatprep.mubr.f32.mxu0 %v3725_v0 }
  0x50   :  { %2891 = vmatmul.mubr.msk.f32.gmra.mrb[18].mxu0 %vm91_vm0, %v74_v40 }
  0x51   :  { %353 = vmatprep.mubr.f32.mxu0 %v3725_v0 }
  0x54   :  { %354 = vmatmul.mubr.f32.vlgmr.msra.gmra.mrb[0].mxu0 %v3725_v0 }
  0x55   :  { %3013 = vmatpush1.bf16.msra.mxu0 %v3843_v14  ;;  %473 = vmatprep.mubr.f32.mxu0 %v3725_v0 }
  0x56   :  { %3015 = vmatprep.subr.bf16.mxu0 %v3849_v16 }
  0x59   :  { %3017 = vmatpush1.bf16.msra.mxu0 %v3869_v22 }
  0x5a   :  { %3019 = vmatprep.subr.bf16.mxu0 %v3872_v23 }
  0x5d   :  { %3021 = vmatpush1.bf16.msra.mxu0 %v3892_v29 }
  0x5e   :  { %3023 = vmatprep.subr.bf16.mxu0 %v3895_v30 }
  0x61   :  { %3025 = vmatpush1.bf16.msra.mxu0 %v3909_v34 }
  0x62   :  { %3027 = vmatprep.subr.bf16.mxu0 %v3835_v11 }
 0x127   :  { %v355_v46 = vpop.f32.mrb[0].mxu0 }
 0x128   :  { %v3342_v47 = vadd.f32 %v355_v46, %v3964_v45  ;;  %v357_v48 = vpop.f32.mrb[1].mxu0 }
 0x129   :  { %v3343_v52 = vadd.f32 %v357_v48, %v3970_v51 }
 0x12a   :  { %v2892_v49 = vmul.f32 -1.442695, %v3342_v47 }
 0x12b   :  { %v2893_v7 = vmul.f32 -1.442695, %v3343_v52 }
 0x12c   :  { %3433 = vpow2.f32 %v2892_v49 }
 0x12d   :  { %3435 = vtanh.f32 %v3343_v52 }
 0x136   :  { %v3434_v53 = vpop.eup %3433 }
 0x137   :  { %v365_v54 = vadd.f32 1.0, %v3434_v53  ;;  %v3436_v55 = vpop.eup %3435 }
 0x139   :  { %3437 = vrcp.f32 %v365_v54 }
 0x13a   :  { %3439 = vpow2.f32 %v2893_v7 }
 0x143   :  { %v3438_v56 = vpop.eup %3437 }
 0x144   :  { %v376_v57 = vmul.f32 %v3438_v56, %v3436_v55  ;;  %v3440_v8 = vpop.eup %3439  ;;  %v375_v10 = vmul.f32 0.0, %v3438_v56 }
 0x145   :  { %v372_v9 = vadd.f32 1.0, %v3440_v8 }
 0x146   :  { %378 = vrot.lane.b32.xlu0 %v376_v57, %s3726_s4 }
 0x147   :  { %3441 = vrcp.f32 %v372_v9 }
 0x151   :  { %v3442_v32 = vpop.eup %3441 }
 0x1b8   :  { %v379_v12 = vpop.permute.xlu0 %378 }
 0x1b9   :  { %v381_v17 = vadd.f32 %v379_v12, %v375_v10 }
 0x1bb   :  { %3443 = vtanh.f32 %v381_v17 }
 0x1c5   :  { %v3444_v33 = vpop.eup %3443 }
 0x1c6   :  { %v383_v35 = vmul.f32 %v3444_v33, %v3442_v32 }
 0x1c8   :  { %385 = vrot.lane.b32.xlu0 %v383_v35, %s3726_s4 }
 0x23a   :  { %v386_v36 = vpop.permute.xlu0 %385 }
 0x23b   :  { %388 = vst.msk [vmem:[#allocation3] sm:$0xff] %vm285_vm1, %v386_v36  ;;  %2894 = vmatmul.mubr.msk.f32.vlgmr.msra.gmra.mrb[2].mxu0 %vm285_vm1, %v386_v36 }
 0x23c   :  { %3029 = vmatpush1.bf16.msra.mxu0 %v3843_v14  ;;  %593 = vmatprep.mubr.f32.mxu0 %v3725_v0 }
 0x23d   :  { %3031 = vmatprep.subr.bf16.mxu0 %v3849_v16 }
 0x240   :  { %3033 = vmatpush1.bf16.msra.mxu0 %v3869_v22 }
 0x241   :  { %3035 = vmatprep.subr.bf16.mxu0 %v3872_v23 }
 0x242   :  { %v1469_v37 = vld [vmem:[#allocation3] sm:$0xff] }
 0x243   :  { %2921 = vmatmul.mubr.msk.f32.vlgmr.msra.gmra.mrb[0].mxu1 %vm285_vm1, %v1469_v37 }
 0x244   :  { %3037 = vmatpush1.bf16.msra.mxu0 %v3892_v29  ;;  %1607 = vmatprep.mubr.f32.mxu1 %v3725_v0 }
 0x245   :  { %3039 = vmatprep.subr.bf16.mxu0 %v3895_v30 }
 0x248   :  { %3041 = vmatpush1.bf16.msra.mxu0 %v3909_v34 }
 0x249   :  { %3043 = vmatprep.subr.bf16.mxu0 %v3835_v11 }
 0x30e   :  { %v475_v38 = vpop.f32.mrb[2].mxu0 }
 0x30f   :  { %v3344_v39 = vadd.f32 %v475_v38, %v3964_v45  ;;  %v477_v40 = vpop.f32.mrb[3].mxu0 }
 0x310   :  { %v3345_v44 = vadd.f32 %v477_v40, %v3970_v51 }
 0x311   :  { %v2895_v41 = vmul.f32 -1.442695, %v3344_v39 }
 0x312   :  { %v2896_v53 = vmul.f32 -1.442695, %v3345_v44 }
 0x313   :  { %3445 = vpow2.f32 %v2895_v41 }
 0x314   :  { %3447 = vtanh.f32 %v3345_v44 }
 0x31d   :  { %v3446_v46 = vpop.eup %3445 }
 0x31e   :  { %v485_v47 = vadd.f32 1.0, %v3446_v46  ;;  %v3448_v48 = vpop.eup %3447 }
 0x320   :  { %3449 = vrcp.f32 %v485_v47 }
 0x321   :  { %3451 = vpow2.f32 %v2896_v53 }
 0x32a   :  { %v3450_v49 = vpop.eup %3449 }
 0x32b   :  { %v496_v52 = vmul.f32 %v3450_v49, %v3448_v48  ;;  %v3452_v54 = vpop.eup %3451  ;;  %v495_v56 = vmul.f32 %v3450_v49, %v381_v17 }
 0x32c   :  { %v492_v55 = vadd.f32 1.0, %v3452_v54 }
 0x32d   :  { %498 = vrot.lane.b32.xlu1 %v496_v52, %s3726_s4 }
 0x32e   :  { %3453 = vrcp.f32 %v492_v55 }
 0x338   :  { %v3454_v59 = vpop.eup %3453 }
 0x39f   :  { %v499_v57 = vpop.permute.xlu1 %498 }
 0x3a0   :  { %v501_v58 = vadd.f32 %v499_v57, %v495_v56 }
 0x3a2   :  { %3455 = vtanh.f32 %v501_v58 }
 0x3ac   :  { %v3456_v60 = vpop.eup %3455 }
 0x3ad   :  { %v503_v61 = vmul.f32 %v3456_v60, %v3454_v59 }
 0x3af   :  { %505 = vrot.lane.b32.xlu1 %v503_v61, %s3726_s4 }
 0x421   :  { %v506_v62 = vpop.permute.xlu1 %505 }
 0x422   :  { %508 = vst.msk [vmem:[#allocation3 + $0x8] sm:$0xff] %vm285_vm1, %v506_v62  ;;  %2897 = vmatmul.mubr.msk.f32.vlgmr.msra.gmra.mrb[4].mxu0 %vm285_vm1, %v506_v62 }
 0x423   :  { %3045 = vmatpush1.bf16.msra.mxu0 %v3843_v14  ;;  %713 = vmatprep.mubr.f32.mxu0 %v3725_v0 }
 0x424   :  { %3047 = vmatprep.subr.bf16.mxu0 %v3849_v16 }
 0x427   :  { %3049 = vmatpush1.bf16.msra.mxu0 %v3869_v22 }
 0x428   :  { %3051 = vmatprep.subr.bf16.mxu0 %v3872_v23 }
 0x429   :  { %v1470_v63 = vld [vmem:[#allocation3 + $0x8] sm:$0xff] }
 0x42a   :  { %2922 = vmatmul.mubr.msk.f32.gmra.mrb[2].mxu1 %vm285_vm1, %v1470_v63 }
 0x42b   :  { %3053 = vmatpush1.bf16.msra.mxu0 %v3892_v29  ;;  %1613 = vmatprep.mubr.f32.mxu1 %v3725_v0 }
 0x42c   :  { %3055 = vmatprep.subr.bf16.mxu0 %v3895_v30 }
 0x42f   :  { %3057 = vmatpush1.bf16.msra.mxu0 %v3909_v34 }
 0x430   :  { %3059 = vmatprep.subr.bf16.mxu0 %v3835_v11 }
 0x4f5   :  { %v595_v1 = vpop.f32.mrb[4].mxu0 }
 0x4f6   :  { %v3346_v2 = vadd.f32 %v595_v1, %v3964_v45  ;;  %v597_v3 = vpop.f32.mrb[5].mxu0 }
 0x4f7   :  { %v3347_v5 = vadd.f32 %v597_v3, %v3970_v51 }
 0x4f8   :  { %v2898_v4 = vmul.f32 -1.442695, %v3346_v2 }
 0x4f9   :  { %v2899_v12 = vmul.f32 -1.442695, %v3347_v5 }
 0x4fa   :  { %3457 = vpow2.f32 %v2898_v4 }
 0x4fb   :  { %3459 = vtanh.f32 %v3347_v5 }
 0x504   :  { %v3458_v6 = vpop.eup %3457 }
 0x505   :  { %v605_v7 = vadd.f32 1.0, %v3458_v6  ;;  %v3460_v8 = vpop.eup %3459 }
 0x507   :  { %3461 = vrcp.f32 %v605_v7 }
 0x508   :  { %3463 = vpow2.f32 %v2899_v12 }
 0x511   :  { %v3462_v9 = vpop.eup %3461 }
 0x512   :  { %v616_v10 = vmul.f32 %v3462_v9, %v3460_v8  ;;  %v3464_v13 = vpop.eup %3463  ;;  %v615_v17 = vmul.f32 %v3462_v9, %v501_v58 }
 0x513   :  { %v612_v15 = vadd.f32 1.0, %v3464_v13 }
 0x514   :  { %618 = vrot.lane.b32.xlu0 %v616_v10, %s3726_s4 }
 0x515   :  { %3465 = vrcp.f32 %v612_v15 }
 0x51f   :  { %v3466_v20 = vpop.eup %3465 }
 0x586   :  { %v619_v18 = vpop.permute.xlu0 %618 }
 0x587   :  { %v621_v19 = vadd.f32 %v619_v18, %v615_v17 }
 0x589   :  { %3467 = vtanh.f32 %v621_v19 }
 0x593   :  { %v3468_v21 = vpop.eup %3467 }
 0x594   :  { %v623_v24 = vmul.f32 %v3468_v21, %v3466_v20 }
 0x596   :  { %625 = vrot.lane.b32.xlu1 %v623_v24, %s3726_s4 }
 0x608   :  { %v626_v25 = vpop.permute.xlu1 %625 }
 0x609   :  { %628 = vst.msk [vmem:[#allocation3 + $0x10] sm:$0xff] %vm285_vm1, %v626_v25  ;;  %2900 = vmatmul.mubr.msk.f32.vlgmr.msra.gmra.mrb[6].mxu0 %vm285_vm1, %v626_v25 }
 0x60a   :  { %3061 = vmatpush1.bf16.msra.mxu0 %v3843_v14  ;;  %833 = vmatprep.mubr.f32.mxu0 %v3725_v0 }
 0x60b   :  { %3063 = vmatprep.subr.bf16.mxu0 %v3849_v16 }
 0x60e   :  { %3065 = vmatpush1.bf16.msra.mxu0 %v3869_v22 }
 0x60f   :  { %3067 = vmatprep.subr.bf16.mxu0 %v3872_v23 }
 0x610   :  { %v1471_v26 = vld [vmem:[#allocation3 + $0x10] sm:$0xff] }
 0x611   :  { %2923 = vmatmul.mubr.msk.f32.gmra.mrb[4].mxu1 %vm285_vm1, %v1471_v26 }
 0x612   :  { %3069 = vmatpush1.bf16.msra.mxu0 %v3892_v29  ;;  %1619 = vmatprep.mubr.f32.mxu1 %v3725_v0 }
 0x613   :  { %3071 = vmatprep.subr.bf16.mxu0 %v3895_v30 }
 0x616   :  { %3073 = vmatpush1.bf16.msra.mxu0 %v3909_v34 }
 0x617   :  { %3075 = vmatprep.subr.bf16.mxu0 %v3835_v11 }
 0x6dc   :  { %v715_v27 = vpop.f32.mrb[6].mxu0 }
 0x6dd   :  { %v3348_v28 = vadd.f32 %v715_v27, %v3964_v45  ;;  %v717_v31 = vpop.f32.mrb[7].mxu0 }
 0x6de   :  { %v3349_v33 = vadd.f32 %v717_v31, %v3970_v51 }
 0x6df   :  { %v2901_v32 = vmul.f32 -1.442695, %v3348_v28 }
 0x6e0   :  { %v2902_v40 = vmul.f32 -1.442695, %v3349_v33 }
 0x6e1   :  { %3469 = vpow2.f32 %v2901_v32 }
 0x6e2   :  { %3471 = vtanh.f32 %v3349_v33 }
 0x6eb   :  { %v3470_v35 = vpop.eup %3469 }
 0x6ec   :  { %v725_v36 = vadd.f32 1.0, %v3470_v35  ;;  %v3472_v37 = vpop.eup %3471 }
 0x6ee   :  { %3473 = vrcp.f32 %v725_v36 }
 0x6ef   :  { %3475 = vpow2.f32 %v2902_v40 }
 0x6f8   :  { %v3474_v38 = vpop.eup %3473 }
 0x6f9   :  { %v736_v39 = vmul.f32 %v3474_v38, %v3472_v37  ;;  %v3476_v41 = vpop.eup %3475  ;;  %v735_v46 = vmul.f32 %v3474_v38, %v621_v19 }
 0x6fa   :  { %v732_v44 = vadd.f32 1.0, %v3476_v41 }
 0x6fb   :  { %738 = vrot.lane.b32.xlu0 %v736_v39, %s3726_s4 }
 0x6fc   :  { %3477 = vrcp.f32 %v732_v44 }
 0x706   :  { %v3478_v49 = vpop.eup %3477 }
 0x76d   :  { %v739_v47 = vpop.permute.xlu0 %738 }
 0x76e   :  { %v741_v48 = vadd.f32 %v739_v47, %v735_v46 }
 0x770   :  { %3479 = vtanh.f32 %v741_v48 }
 0x77a   :  { %v3480_v52 = vpop.eup %3479 }
 0x77b   :  { %v743_v53 = vmul.f32 %v3480_v52, %v3478_v49 }
 0x77d   :  { %745 = vrot.lane.b32.xlu1 %v743_v53, %s3726_s4 }
 0x7ef   :  { %v746_v54 = vpop.permute.xlu1 %745 }
 0x7f0   :  { %748 = vst.msk [vmem:[#allocation3 + $0x18] sm:$0xff] %vm285_vm1, %v746_v54  ;;  %2903 = vmatmul.mubr.msk.f32.vlgmr.msra.gmra.mrb[8].mxu0 %vm285_vm1, %v746_v54 }
 0x7f1   :  { %3077 = vmatpush1.bf16.msra.mxu0 %v3843_v14  ;;  %953 = vmatprep.mubr.f32.mxu0 %v3725_v0 }
 0x7f2   :  { %3079 = vmatprep.subr.bf16.mxu0 %v3849_v16 }
 0x7f5   :  { %3081 = vmatpush1.bf16.msra.mxu0 %v3869_v22 }
 0x7f6   :  { %3083 = vmatprep.subr.bf16.mxu0 %v3872_v23 }
 0x7f7   :  { %v1472_v55 = vld [vmem:[#allocation3 + $0x18] sm:$0xff] }
 0x7f8   :  { %2924 = vmatmul.mubr.msk.f32.gmra.mrb[6].mxu1 %vm285_vm1, %v1472_v55 }
 0x7f9   :  { %3085 = vmatpush1.bf16.msra.mxu0 %v3892_v29  ;;  %1625 = vmatprep.mubr.f32.mxu1 %v3725_v0 }
 0x7fa   :  { %3087 = vmatprep.subr.bf16.mxu0 %v3895_v30 }
 0x7fd   :  { %3089 = vmatpush1.bf16.msra.mxu0 %v3909_v34 }
 0x7fe   :  { %3091 = vmatprep.subr.bf16.mxu0 %v3835_v11 }
 0x8c3   :  { %v835_v56 = vpop.f32.mrb[8].mxu0 }
 0x8c4   :  { %v3350_v57 = vadd.f32 %v835_v56, %v3964_v45  ;;  %v837_v58 = vpop.f32.mrb[9].mxu0 }
 0x8c5   :  { %v3351_v60 = vadd.f32 %v837_v58, %v3970_v51 }
 0x8c6   :  { %v2904_v59 = vmul.f32 -1.442695, %v3350_v57 }
 0x8c7   :  { %v2905_v3 = vmul.f32 -1.442695, %v3351_v60 }
 0x8c8   :  { %3481 = vpow2.f32 %v2904_v59 }
 0x8c9   :  { %3483 = vtanh.f32 %v3351_v60 }
 0x8d2   :  { %v3482_v61 = vpop.eup %3481 }
 0x8d3   :  { %v845_v62 = vadd.f32 1.0, %v3482_v61  ;;  %v3484_v63 = vpop.eup %3483 }
 0x8d5   :  { %3485 = vrcp.f32 %v845_v62 }
 0x8d6   :  { %3487 = vpow2.f32 %v2905_v3 }
 0x8df   :  { %v3486_v1 = vpop.eup %3485 }
 0x8e0   :  { %v856_v2 = vmul.f32 %v3486_v1, %v3484_v63  ;;  %v3488_v4 = vpop.eup %3487  ;;  %v855_v6 = vmul.f32 %v3486_v1, %v741_v48 }
 0x8e1   :  { %v852_v5 = vadd.f32 1.0, %v3488_v4 }
 0x8e2   :  { %858 = vrot.lane.b32.xlu0 %v856_v2, %s3726_s4 }
 0x8e3   :  { %3489 = vrcp.f32 %v852_v5 }
 0x8ed   :  { %v3490_v9 = vpop.eup %3489 }
 0x954   :  { %v859_v7 = vpop.permute.xlu0 %858 }
 0x955   :  { %v861_v8 = vadd.f32 %v859_v7, %v855_v6 }
 0x957   :  { %3491 = vtanh.f32 %v861_v8 }
 0x961   :  { %v3492_v10 = vpop.eup %3491 }
 0x962   :  { %v863_v12 = vmul.f32 %v3492_v10, %v3490_v9  ;;  %v1234_v9 = vld [vmem:[%s4425_s3 + $0x18] sm:$0xff]  ;;  %v1231_v10 = vld [vmem:[%s4425_s3] sm:$0xff] }
 0x964   :  { %865 = vrot.lane.b32.xlu1 %v863_v12, %s3726_s4 }
 0x9d6   :  { %v866_v13 = vpop.permute.xlu1 %865 }
 0x9d7   :  { %868 = vst.msk [vmem:[#allocation3 + $0x20] sm:$0xff] %vm285_vm1, %v866_v13  ;;  %2906 = vmatmul.mubr.msk.f32.vlgmr.msra.gmra.mrb[10].mxu0 %vm285_vm1, %v866_v13  ;;  %v1233_v13 = vld [vmem:[%s4425_s3 + $0x10] sm:$0xff] }
 0x9d8   :  { %3093 = vmatpush1.bf16.msra.mxu0 %v3843_v14  ;;  %1073 = vmatprep.mubr.f32.mxu0 %v3725_v0 }
 0x9d9   :  { %3095 = vmatprep.subr.bf16.mxu0 %v3849_v16 }
 0x9dc   :  { %3097 = vmatpush1.bf16.msra.mxu0 %v3869_v22 }
 0x9dd   :  { %3099 = vmatprep.subr.bf16.mxu0 %v3872_v23 }
 0x9de   :  { %v1473_v15 = vld [vmem:[#allocation3 + $0x20] sm:$0xff] }
 0x9df   :  { %2925 = vmatmul.mubr.msk.f32.gmra.mrb[8].mxu1 %vm285_vm1, %v1473_v15  ;;  %v1236_v15 = vld [vmem:[%s4425_s3 + $0x28] sm:$0xff] }
 0x9e0   :  { %3101 = vmatpush1.bf16.msra.mxu0 %v3892_v29  ;;  %1631 = vmatprep.mubr.f32.mxu1 %v3725_v0 }
 0x9e1   :  { %3103 = vmatprep.subr.bf16.mxu0 %v3895_v30 }
 0x9e4   :  { %3105 = vmatpush1.bf16.msra.mxu0 %v3909_v34 }
 0x9e5   :  { %3107 = vmatprep.subr.bf16.mxu0 %v3835_v11 }
 0xaaa   :  { %v955_v17 = vpop.f32.mrb[10].mxu0 }
 0xaab   :  { %v3352_v18 = vadd.f32 %v955_v17, %v3964_v45  ;;  %v957_v19 = vpop.f32.mrb[11].mxu0  ;;  %v1238_v17 = vld [vmem:[%s4425_s3 + $0x38] sm:$0xff] }
 0xaac   :  { %v3353_v21 = vadd.f32 %v957_v19, %v3970_v51  ;;  %v3126_v19 = vpack.c.bf16 %v1238_v17, %v1236_v15 }
 0xaad   :  { %v2907_v20 = vmul.f32 -1.442695, %v3352_v18  ;;  %v3124_v18 = vpack.c.bf16 %v1233_v13, %v1231_v10 }
 0xaae   :  { %v2908_v31 = vmul.f32 -1.442695, %v3353_v21 }
 0xaaf   :  { %3493 = vpow2.f32 %v2907_v20  ;;  %v1235_v20 = vld [vmem:[%s4425_s3 + $0x20] sm:$0xff] }
 0xab0   :  { %3495 = vtanh.f32 %v3353_v21  ;;  %v1237_v21 = vld [vmem:[%s4425_s3 + $0x30] sm:$0xff] }
 0xab9   :  { %v3494_v24 = vpop.eup %3493 }
 0xaba   :  { %v965_v25 = vadd.f32 1.0, %v3494_v24  ;;  %v3496_v26 = vpop.eup %3495  ;;  %v1240_v24 = vld [vmem:[%s4425_s3 + $0x48] sm:$0xff] }
 0xabc   :  { %3497 = vrcp.f32 %v965_v25  ;;  %v1242_v25 = vld [vmem:[%s4425_s3 + $0x58] sm:$0xff] }
 0xabd   :  { %3499 = vpow2.f32 %v2908_v31  ;;  %v1241_v31 = vld [vmem:[%s4425_s3 + $0x50] sm:$0xff] }
 0xac6   :  { %v3498_v27 = vpop.eup %3497 }
 0xac7   :  { %v976_v28 = vmul.f32 %v3498_v27, %v3496_v26  ;;  %v3500_v11 = vpop.eup %3499  ;;  %v975_v33 = vmul.f32 %v3498_v27, %v861_v8  ;;  %v1232_v8 = vld [vmem:[%s4425_s3 + $0x8] sm:$0xff]  ;;  %v3128_v26 = vpack.c.bf16 %v1237_v21, %v1235_v20  ;;  %v3130_v27 = vpack.c.bf16 %v1242_v25, %v1240_v24  ;;  %v1684_v21 = vld [vmem:[#allocation6] sm:$0xff]  ;;  %v1689_v25 = vld [vmem:[#allocation6 + $0x28] sm:$0xff] }
 0xac8   :  { %v972_v32 = vadd.f32 1.0, %v3500_v11  ;;  %v3122_v12 = vpack.c.bf16 %v1234_v9, %v1232_v8  ;;  %v1244_v11 = vld [vmem:[%s4425_s3 + $0x68] sm:$0xff] }
 0xac9   :  { %978 = vrot.lane.b32.xlu0 %v976_v28, %s3726_s4  ;;  %v1239_v28 = vld [vmem:[%s4425_s3 + $0x40] sm:$0xff]  ;;  %v1687_v20 = vld [vmem:[#allocation6 + $0x18] sm:$0xff] }
 0xaca   :  { %3501 = vrcp.f32 %v972_v32  ;;  %v1246_v32 = vld [vmem:[%s4425_s3 + $0x78] sm:$0xff] }
 0xad4   :  { %v3502_v37 = vpop.eup %3501 }
 0xb3b   :  { %v979_v35 = vpop.permute.xlu0 %978 }
 0xb3c   :  { %v981_v36 = vadd.f32 %v979_v35, %v975_v33  ;;  %v3132_v33 = vpack.c.bf16 %v1241_v31, %v1239_v28  ;;  %v3134_v35 = vpack.c.bf16 %v1246_v32, %v1244_v11  ;;  %v1688_v28 = vld [vmem:[#allocation6 + $0x20] sm:$0xff]  ;;  %v1690_v31 = vld [vmem:[#allocation6 + $0x30] sm:$0xff]  ;;  %v1693_v11 = vld [vmem:[#allocation6 + $0x48] sm:$0xff] }
 0xb3d   :  { %v1695_v32 = vld [vmem:[#allocation6 + $0x58] sm:$0xff] }
 0xb3e   :  { %3503 = vtanh.f32 %v981_v36 }
 0xb48   :  { %v3504_v38 = vpop.eup %3503 }
 0xb49   :  { %v983_v39 = vmul.f32 %v3504_v38, %v3502_v37  ;;  %v1245_v37 = vld [vmem:[%s4425_s3 + $0x70] sm:$0xff] }
 0xb4b   :  { %985 = vrot.lane.b32.xlu1 %v983_v39, %s3726_s4 }
 0xbbd   :  { %v986_v40 = vpop.permute.xlu1 %985 }
 0xbbe   :  { %988 = vst.msk [vmem:[#allocation3 + $0x28] sm:$0xff] %vm285_vm1, %v986_v40  ;;  %2909 = vmatmul.mubr.msk.f32.vlgmr.msra.gmra.mrb[12].mxu0 %vm285_vm1, %v986_v40 }
 0xbbf   :  { %3109 = vmatpush1.bf16.msra.mxu0 %v3843_v14  ;;  %1193 = vmatprep.mubr.f32.mxu0 %v3725_v0 }
 0xbc0   :  { %3111 = vmatprep.subr.bf16.mxu0 %v3849_v16 }
 0xbc3   :  { %3113 = vmatpush1.bf16.msra.mxu0 %v3869_v22 }
 0xbc4   :  { %3115 = vmatprep.subr.bf16.mxu0 %v3872_v23 }
 0xbc5   :  { %v1474_v41 = vld [vmem:[#allocation3 + $0x28] sm:$0xff] }
 0xbc6   :  { %2926 = vmatmul.mubr.msk.f32.gmra.mrb[10].mxu1 %vm285_vm1, %v1474_v41 }
 0xbc7   :  { %3117 = vmatpush1.bf16.msra.mxu0 %v3892_v29  ;;  %1637 = vmatprep.mubr.f32.mxu1 %v3725_v0 }
 0xbc8   :  { %3119 = vmatprep.subr.bf16.mxu0 %v3895_v30 }
 0xbcb   :  { %3121 = vmatpush1.bf16.msra.mxu0 %v3909_v34 }
 0xbcc   :  { %3123 = vmatprep.subr.bf16.mxu0 %v3122_v12 }
 0xc91   :  { %v1075_v14 = vpop.f32.mrb[12].mxu0 }
 0xc92   :  { %v3354_v44 = vadd.f32 %v1075_v14, %v3964_v45  ;;  %v1077_v46 = vpop.f32.mrb[13].mxu0 }
 0xc93   :  { %v3355_v22 = vadd.f32 %v1077_v46, %v3970_v51 }
 0xc94   :  { %v2910_v16 = vmul.f32 -1.442695, %v3354_v44 }
 0xc95   :  { %v2911_v30 = vmul.f32 -1.442695, %v3355_v22 }
 0xc96   :  { %3505 = vpow2.f32 %v2910_v16 }
 0xc97   :  { %3507 = vtanh.f32 %v3355_v22 }
 0xca0   :  { %v3506_v23 = vpop.eup %3505 }
 0xca1   :  { %v1085_v47 = vadd.f32 1.0, %v3506_v23  ;;  %v3508_v48 = vpop.eup %3507 }
 0xca3   :  { %3509 = vrcp.f32 %v1085_v47 }
 0xca4   :  { %3511 = vpow2.f32 %v2911_v30 }
 0xcad   :  { %v3510_v29 = vpop.eup %3509 }
 0xcae   :  { %v1096_v49 = vmul.f32 %v3510_v29, %v3508_v48  ;;  %v3512_v34 = vpop.eup %3511  ;;  %v1095_v53 = vmul.f32 %v3510_v29, %v981_v36  ;;  %v1243_v36 = vld [vmem:[%s4425_s3 + $0x60] sm:$0xff] }
 0xcaf   :  { %v1092_v52 = vadd.f32 1.0, %v3512_v34  ;;  %v3136_v38 = vpack.c.bf16 %v1245_v37, %v1243_v36  ;;  %v1692_v36 = vld [vmem:[#allocation6 + $0x40] sm:$0xff]  ;;  %v1694_v37 = vld [vmem:[#allocation6 + $0x50] sm:$0xff] }
 0xcb0   :  { %1098 = vrot.lane.b32.xlu0 %v1096_v49, %s3726_s4 }
 0xcb1   :  { %3513 = vrcp.f32 %v1092_v52 }
 0xcbb   :  { %v3514_v56 = vpop.eup %3513 }
 0xd22   :  { %v1099_v54 = vpop.permute.xlu0 %1098 }
 0xd23   :  { %v4075_v55 = vadd.f32 %v1099_v54, %v1095_v53 }
 0xd25   :  { %3515 = vtanh.f32 %v4075_v55 }
 0xd2f   :  { %v3516_v57 = vpop.eup %3515 }
 0xd30   :  { %v1103_v58 = vmul.f32 %v3516_v57, %v3514_v56 }
 0xd32   :  { %1105 = vrot.lane.b32.xlu1 %v1103_v58, %s3726_s4 }
 0xda4   :  { %v1106_v59 = vpop.permute.xlu1 %1105 }
 0xda5   :  { %1108 = vst.msk [vmem:[#allocation3 + $0x30] sm:$0xff] %vm285_vm1, %v1106_v59  ;;  %2912 = vmatmul.mubr.msk.f32.vlgmr.msra.gmra.mrb[14].mxu0 %vm285_vm1, %v1106_v59 }
 0xda6   :  { %1313 = vmatprep.mubr.f32.mxu0 %v3725_v0  ;;  %3125 = vmatpush1.bf16.msra.mxu0 %v3124_v18 }
 0xda7   :  { %3127 = vmatprep.subr.bf16.mxu0 %v3126_v19 }
 0xdaa   :  { %3129 = vmatpush1.bf16.msra.mxu0 %v3128_v26 }
 0xdab   :  { %3131 = vmatprep.subr.bf16.mxu0 %v3130_v27 }
 0xdac   :  { %v1475_v60 = vld [vmem:[#allocation3 + $0x30] sm:$0xff] }
 0xdad   :  { %2927 = vmatmul.mubr.msk.f32.gmra.mrb[12].mxu1 %vm285_vm1, %v1475_v60 }
 0xdae   :  { %1643 = vmatprep.mubr.f32.mxu1 %v3725_v0  ;;  %3133 = vmatpush1.bf16.msra.mxu0 %v3132_v33 }
 0xdaf   :  { %3135 = vmatprep.subr.bf16.mxu0 %v3134_v35 }
 0xdb2   :  { %3137 = vmatpush1.bf16.msra.mxu0 %v3136_v38 }
 0xdb3   :  { %3139 = vmatprep.subr.bf16.mxu0 %v3122_v12 }
 0xe78   :  { %v1195_v61 = vpop.f32.mrb[14].mxu0 }
 0xe79   :  { %v3356_v62 = vadd.f32 %v1195_v61, %v3964_v45  ;;  %v1197_v63 = vpop.f32.mrb[15].mxu0 }
 0xe7a   :  { %v3357_v2 = vadd.f32 %v1197_v63, %v3970_v51 }
 0xe7b   :  { %v2913_v1 = vmul.f32 -1.442695, %v3356_v62 }
 0xe7c   :  { %v2914_v39 = vmul.f32 -1.442695, %v3357_v2 }
 0xe7d   :  { %3517 = vpow2.f32 %v2913_v1 }
 0xe7e   :  { %3519 = vtanh.f32 %v3357_v2 }
 0xe87   :  { %v3518_v3 = vpop.eup %3517 }
 0xe88   :  { %v1205_v4 = vadd.f32 1.0, %v3518_v3  ;;  %v3520_v5 = vpop.eup %3519 }
 0xe8a   :  { %3521 = vrcp.f32 %v1205_v4 }
 0xe8b   :  { %3523 = vpow2.f32 %v2914_v39 }
 0xe94   :  { %v3522_v6 = vpop.eup %3521 }
 0xe95   :  { %v1216_v7 = vmul.f32 %v3522_v6, %v3520_v5  ;;  %v3524_v40 = vpop.eup %3523  ;;  %v1215_v14 = vmul.f32 %v3522_v6, %v4075_v55 }
 0xe96   :  { %v1212_v41 = vadd.f32 1.0, %v3524_v40 }
 0xe97   :  { %1218 = vrot.lane.b32.xlu0 %v1216_v7, %s3726_s4 }
 0xe98   :  { %3525 = vrcp.f32 %v1212_v41 }
 0xea2   :  { %v3526_v16 = vpop.eup %3525 }
 0xf09   :  { %v1219_v44 = vpop.permute.xlu0 %1218 }
 0xf0a   :  { %v1221_v46 = vadd.f32 %v1219_v44, %v1215_v14 }
 0xf0c   :  { %3527 = vtanh.f32 %v1221_v46 }
 0xf16   :  { %v3528_v22 = vpop.eup %3527 }
 0xf17   :  { %v1223_v23 = vmul.f32 %v3528_v22, %v3526_v16  ;;  %v1697_v16 = vld [vmem:[#allocation6 + $0x68] sm:$0xff]  ;;  %v1699_v22 = vld [vmem:[#allocation6 + $0x78] sm:$0xff] }
 0xf19   :  { %1225 = vrot.lane.b32.xlu1 %v1223_v23, %s3726_s4  ;;  %v1696_v23 = vld [vmem:[#allocation6 + $0x60] sm:$0xff] }
 0xf8b   :  { %v1226_v47 = vpop.permute.xlu1 %1225 }
 0xf8c   :  { %1228 = vst.msk [vmem:[#allocation3 + $0x38] sm:$0xff] %vm285_vm1, %v1226_v47  ;;  %2915 = vmatmul.mubr.msk.f32.vlgmr.msra.gmra.mrb[16].mxu0 %vm285_vm1, %v1226_v47  ;;  %v4171_v47 = vpack.c.bf16 %v1699_v22, %v1697_v16 }
 0xf8d   :  { %3141 = vmatpush1.bf16.msra.mxu0 %v3124_v18  ;;  %1433 = vmatprep.mubr.f32.mxu0 %v3725_v0 }
 0xf8e   :  { %3143 = vmatprep.subr.bf16.mxu0 %v3126_v19  ;;  %v1685_v19 = vld [vmem:[#allocation6 + $0x8] sm:$0xff] }
 0xf8f   :  { %v4153_v24 = vpack.c.bf16 %v1687_v20, %v1685_v19 }
 0xf91   :  { %3145 = vmatpush1.bf16.msra.mxu0 %v3128_v26  ;;  %v1691_v26 = vld [vmem:[#allocation6 + $0x38] sm:$0xff]  ;;  %3171 = vmatprep.subr.bf16.mxu1 %v4153_v24 }
 0xf92   :  { %3147 = vmatprep.subr.bf16.mxu0 %v3130_v27 }
 0xf93   :  { %v1476_v48 = vld [vmem:[#allocation3 + $0x38] sm:$0xff] }
 0xf94   :  { %2928 = vmatmul.mubr.msk.f32.gmra.mrb[14].mxu1 %vm285_vm1, %v1476_v48  ;;  %v1698_v48 = vld [vmem:[#allocation6 + $0x70] sm:$0xff] }
 0xf95   :  { %3149 = vmatpush1.bf16.msra.mxu0 %v3132_v33  ;;  %1649 = vmatprep.mubr.f32.mxu1 %v3725_v0  ;;  %v4161_v33 = vpack.c.bf16 %v1690_v31, %v1688_v28 }
 0xf96   :  { %3151 = vmatprep.subr.bf16.mxu0 %v3134_v35  ;;  %v4164_v35 = vpack.c.bf16 %v1695_v32, %v1693_v11 }
 0xf99   :  { %3153 = vmatpush1.bf16.msra.mxu0 %v3136_v38  ;;  %v4167_v38 = vpack.c.bf16 %v1694_v37, %v1692_v36 }
0x105f   :  { %v1315_v29 = vpop.f32.mrb[16].mxu0 }
0x1060   :  { %v3358_v49 = vadd.f32 %v1315_v29, %v3964_v45  ;;  %v1317_v30 = vpop.f32.mrb[17].mxu0  ;;  %v4173_v29 = vpack.c.bf16 %v1698_v48, %v1696_v23 }
0x1061   :  { %v3359_v52 = vadd.f32 %v1317_v30, %v3970_v51 }
0x1062   :  { %v2916_v34 = vmul.f32 -1.442695, %v3358_v49 }
0x1063   :  { %v2917_v58 = vmul.f32 -1.442695, %v3359_v52 }
0x1064   :  { %3529 = vpow2.f32 %v2916_v34 }
0x1065   :  { %3531 = vtanh.f32 %v3359_v52 }
0x106e   :  { %v3530_v53 = vpop.eup %3529 }
0x106f   :  { %v1325_v54 = vadd.f32 1.0, %v3530_v53  ;;  %v3532_v55 = vpop.eup %3531 }
0x1071   :  { %3533 = vrcp.f32 %v1325_v54  ;;  %v1495_v54 = vld [vmem:[%s4429_s7] sm:$0x3] }
0x1072   :  { %3535 = vpow2.f32 %v2917_v58 }
0x107b   :  { %v3534_v56 = vpop.eup %3533 }
0x107c   :  { %v1336_v57 = vmul.f32 %v3534_v56, %v3532_v55  ;;  %v3536_v59 = vpop.eup %3535  ;;  %v1335_v61 = vmul.f32 %v3534_v56, %v1221_v46  ;;  %v4197_v55 = vrot.slane %v1495_v54, %v83_v43 }
0x107d   :  { %v1332_v60 = vadd.f32 1.0, %v3536_v59 }
0x107e   :  { %1338 = vrot.lane.b32.xlu0 %v1336_v57, %s3726_s4 }
0x107f   :  { %3537 = vrcp.f32 %v1332_v60  ;;  %v4202_v60 = vrot.slane %v1495_v54, %v87_v50 }
0x1089   :  { %v3538_v1 = vpop.eup %3537 }
0x10f0   :  { %v1339_v62 = vpop.permute.xlu0 %1338 }
0x10f1   :  { %v1341_v63 = vadd.f32 %v1339_v62, %v1335_v61 }
0x10f3   :  { %3539 = vtanh.f32 %v1341_v63 }
0x10fd   :  { %v3540_v2 = vpop.eup %3539 }
0x10fe   :  { %v1343_v3 = vmul.f32 %v3540_v2, %v3538_v1 }
0x1100   :  { %1345 = vrot.lane.b32.xlu1 %v1343_v3, %s3726_s4 }
0x1172   :  { %v1346_v4 = vpop.permute.xlu1 %1345 }
0x1173   :  { %1348 = vst.msk [vmem:[#allocation3 + $0x40] sm:$0xff] %vm285_vm1, %v1346_v4  ;;  %2918 = vmatmul.mubr.msk.f32.vlgmr.msra.gmra.mrb[18].mxu0 %vm285_vm1, %v1346_v4 }
0x1174   :  { %2987 = vmatprep.mubr.msk.f32.mxu0 %vm3729_vm12, %v3725_v0 }
0x117a   :  { %v1477_v5 = vld [vmem:[#allocation3 + $0x40] sm:$0xff] }
0x117b   :  { %2929 = vmatmul.mubr.msk.f32.gmra.mrb[16].mxu1 %vm285_vm1, %v1477_v5 }
0x117c   :  { %1655 = vmatprep.mubr.f32.mxu1 %v3725_v0 }
0x1246   :  { %v1435_v6 = vpop.f32.mrb[18].mxu0 }
0x1247   :  { %v3360_v7 = vadd.f32 %v1435_v6, %v3964_v45  ;;  %v1437_v8 = vpop.f32.mrb[19].mxu0  ;;  %v1686_v45 = vld [vmem:[#allocation6 + $0x10] sm:$0xff] }
0x1248   :  { %v3361_v10 = vadd.f32 %v1437_v8, %v3970_v51  ;;  %v4155_v27 = vpack.c.bf16 %v1686_v45, %v1684_v21  ;;  %v4157_v51 = vpack.c.bf16 %v1691_v26, %v1689_v25 }
0x1249   :  { %v2919_v9 = vmul.f32 -1.442695, %v3360_v7 }
0x124a   :  { %3173 = vmatpush1.bf16.msra.mxu1 %v4155_v27  ;;  %v2920_v39 = vmul.f32 -1.442695, %v3361_v10 }
0x124b   :  { %3541 = vpow2.f32 %v2919_v9  ;;  %3175 = vmatprep.subr.bf16.mxu1 %v4157_v51 }
0x124c   :  { %3543 = vtanh.f32 %v3361_v10 }
0x124e   :  { %3177 = vmatpush1.bf16.msra.mxu1 %v4161_v33 }
0x124f   :  { %3179 = vmatprep.subr.bf16.mxu1 %v4164_v35 }
0x1252   :  { %3181 = vmatpush1.bf16.msra.mxu1 %v4167_v38 }
0x1253   :  { %3183 = vmatprep.subr.bf16.mxu1 %v4171_v47 }
0x1255   :  { %v3542_v12 = vpop.eup %3541 }
0x1256   :  { %v1445_v13 = vadd.f32 1.0, %v3542_v12  ;;  %v3544_v15 = vpop.eup %3543  ;;  %3185 = vmatpush1.bf16.msra.mxu1 %v4173_v29 }
0x1257   :  { %3187 = vmatprep.subr.bf16.mxu1 %v4153_v24 }
0x1258   :  { %3545 = vrcp.f32 %v1445_v13 }
0x1259   :  { %3547 = vpow2.f32 %v2920_v39 }
0x1262   :  { %v3546_v17 = vpop.eup %3545 }
0x1263   :  { %v1456_v18 = vmul.f32 %v3546_v17, %v3544_v15  ;;  %v3548_v40 = vpop.eup %3547  ;;  %v1455_v14 = vmul.f32 %v3546_v17, %v1341_v63 }
0x1264   :  { %v1452_v41 = vadd.f32 1.0, %v3548_v40 }
0x1265   :  { %1458 = vrot.lane.b32.xlu0 %v1456_v18, %s3726_s4 }
0x1266   :  { %3549 = vrcp.f32 %v1452_v41 }
0x1270   :  { %v3550_v49 = vpop.eup %3549 }
0x12d7   :  { %v1459_v44 = vpop.permute.xlu0 %1458 }
0x12d8   :  { %v1461_v46 = vadd.f32 %v1459_v44, %v1455_v14 }
0x12da   :  { %3551 = vtanh.f32 %v1461_v46 }
0x12e4   :  { %v3552_v30 = vpop.eup %3551 }
0x12e5   :  { %v1463_v34 = vmul.f32 %v3552_v30, %v3550_v49 }
0x12e7   :  { %1465 = vrot.lane.b32.xlu1 %v1463_v34, %s3726_s4 }
0x1359   :  { %v1466_v52 = vpop.permute.xlu1 %1465 }
0x135a   :  { %1468 = vst.msk [vmem:[#allocation3 + $0x48] sm:$0xff] %vm285_vm1, %v1466_v52 }
0x1361   :  { %v1478_v53 = vld [vmem:[#allocation3 + $0x48] sm:$0xff] }
0x1362   :  { %2930 = vmatmul.mubr.msk.f32.gmra.mrb[18].mxu1 %vm285_vm1, %v1478_v53 }
0x1363   :  { %1764 = vmatprep.mubr.f32.mxu1 %v3725_v0 }
0x1366   :  { %1765 = vmatmul.mubr.f32.vlgmr.msra.gmra.mrb[0].mxu1 %v3725_v0 }
0x1367   :  { %3189 = vmatpush1.bf16.msra.mxu1 %v4155_v27  ;;  %1873 = vmatprep.mubr.f32.mxu1 %v3725_v0 }
0x1368   :  { %3191 = vmatprep.subr.bf16.mxu1 %v4157_v51 }
0x136b   :  { %3193 = vmatpush1.bf16.msra.mxu1 %v4161_v33 }
0x136c   :  { %3195 = vmatprep.subr.bf16.mxu1 %v4164_v35 }
0x136f   :  { %3197 = vmatpush1.bf16.msra.mxu1 %v4167_v38 }
0x1370   :  { %3199 = vmatprep.subr.bf16.mxu1 %v4171_v47 }
0x1373   :  { %3201 = vmatpush1.bf16.msra.mxu1 %v4173_v29 }
0x1374   :  { %3203 = vmatprep.subr.bf16.mxu1 %v4153_v24 }
0x1439   :  { %v1766_v56 = vpop.f32.mrb[0].mxu1 }
0x143a   :  { %v3362_v57 = vadd.f32 %v1766_v56, %v4197_v55  ;;  %v1768_v58 = vpop.f32.mrb[1].mxu1 }
0x143b   :  { %v3363_v61 = vadd.f32 %v1768_v58, %v4202_v60 }
0x143c   :  { %v2931_v59 = vmul.f32 -1.442695, %v3362_v57 }
0x143d   :  { %v2932_v3 = vmul.f32 -1.442695, %v3363_v61 }
0x143e   :  { %3553 = vpow2.f32 %v2931_v59 }
0x143f   :  { %3555 = vtanh.f32 %v3363_v61 }
0x1448   :  { %v3554_v62 = vpop.eup %3553 }
0x1449   :  { %v1776_v63 = vadd.f32 1.0, %v3554_v62  ;;  %v3556_v1 = vpop.eup %3555 }
0x144b   :  { %3557 = vrcp.f32 %v1776_v63 }
0x144c   :  { %3559 = vpow2.f32 %v2932_v3 }
0x1455   :  { %v3558_v2 = vpop.eup %3557 }
0x1456   :  { %v1787_v43 = vmul.f32 %v3558_v2, %v3556_v1  ;;  %v3560_v4 = vpop.eup %3559  ;;  %v1786_v6 = vmul.f32 0.0, %v3558_v2 }
0x1457   :  { %v1783_v5 = vadd.f32 1.0, %v3560_v4 }
0x1458   :  { %1789 = vrot.lane.b32.xlu0 %v1787_v43, %s3726_s4 }
0x1459   :  { %3561 = vrcp.f32 %v1783_v5 }
0x1463   :  { %v3562_v50 = vpop.eup %3561 }
0x14ca   :  { %v1790_v7 = vpop.permute.xlu0 %1789 }
0x14cb   :  { %v1792_v42 = vadd.f32 %v1790_v7, %v1786_v6 }
0x14cd   :  { %3563 = vtanh.f32 %v1792_v42 }
0x14d7   :  { %v3564_v8 = vpop.eup %3563 }
0x14d8   :  { %v4206_v9 = vmul.f32 %v3564_v8, %v3562_v50 }
0x14da   :  { %1805 = vrot.lane.b32.xlu1 %v4206_v9, %s3726_s4 }
0x154c   :  { %v1806_v10 = vpop.permute.xlu1 %1805 }
0x154d   :  { %2933 = vmatmul.mubr.msk.f32.vlgmr.msra.gmra.mrb[2].mxu1 %vm285_vm1, %v1806_v10 }
0x154e   :  { %3205 = vmatpush1.bf16.msra.mxu1 %v4155_v27  ;;  %1982 = vmatprep.mubr.f32.mxu1 %v3725_v0 }
0x154f   :  { %3207 = vmatprep.subr.bf16.mxu1 %v4157_v51 }
0x1552   :  { %3209 = vmatpush1.bf16.msra.mxu1 %v4161_v33 }
0x1553   :  { %3211 = vmatprep.subr.bf16.mxu1 %v4164_v35 }
0x1556   :  { %3213 = vmatpush1.bf16.msra.mxu1 %v4167_v38 }
0x1557   :  { %3215 = vmatprep.subr.bf16.mxu1 %v4171_v47 }
0x155a   :  { %3217 = vmatpush1.bf16.msra.mxu1 %v4173_v29 }
0x155b   :  { %3219 = vmatprep.subr.bf16.mxu1 %v4153_v24 }
0x1620   :  { %v1875_v12 = vpop.f32.mrb[2].mxu1 }
0x1621   :  { %v3364_v13 = vadd.f32 %v1875_v12, %v4197_v55  ;;  %v1877_v15 = vpop.f32.mrb[3].mxu1 }
0x1622   :  { %v3365_v18 = vadd.f32 %v1877_v15, %v4202_v60 }
0x1623   :  { %v2934_v17 = vmul.f32 -1.442695, %v3364_v13 }
0x1624   :  { %v2935_v26 = vmul.f32 -1.442695, %v3365_v18 }
0x1625   :  { %3565 = vpow2.f32 %v2934_v17 }
0x1626   :  { %3567 = vtanh.f32 %v3365_v18 }
0x162f   :  { %v3566_v19 = vpop.eup %3565 }
0x1630   :  { %v1885_v20 = vadd.f32 1.0, %v3566_v19  ;;  %v3568_v21 = vpop.eup %3567 }
0x1632   :  { %3569 = vrcp.f32 %v1885_v20 }
0x1633   :  { %3571 = vpow2.f32 %v2935_v26 }
0x163c   :  { %v3570_v45 = vpop.eup %3569 }
0x163d   :  { %v1896_v25 = vmul.f32 %v3570_v45, %v3568_v21  ;;  %v3572_v28 = vpop.eup %3571  ;;  %v1895_v11 = vmul.f32 %v3570_v45, %v1792_v42 }
0x163e   :  { %v1892_v31 = vadd.f32 1.0, %v3572_v28 }
0x163f   :  { %1898 = vrot.lane.b32.xlu0 %v1896_v25, %s3726_s4 }
0x1640   :  { %3573 = vrcp.f32 %v1892_v31 }
0x164a   :  { %v3574_v37 = vpop.eup %3573 }
0x16b1   :  { %v1899_v32 = vpop.permute.xlu0 %1898 }
0x16b2   :  { %v1901_v36 = vadd.f32 %v1899_v32, %v1895_v11 }
0x16b4   :  { %3575 = vtanh.f32 %v1901_v36 }
0x16be   :  { %v3576_v39 = vpop.eup %3575 }
0x16bf   :  { %v4223_v40 = vmul.f32 %v3576_v39, %v3574_v37 }
0x16c1   :  { %1914 = vrot.lane.b32.xlu1 %v4223_v40, %s3726_s4 }
0x1733   :  { %v1915_v41 = vpop.permute.xlu1 %1914 }
0x1734   :  { %2936 = vmatmul.mubr.msk.f32.vlgmr.msra.gmra.mrb[4].mxu1 %vm285_vm1, %v1915_v41 }
0x1735   :  { %3221 = vmatpush1.bf16.msra.mxu1 %v4155_v27  ;;  %2091 = vmatprep.mubr.f32.mxu1 %v3725_v0 }
0x1736   :  { %3223 = vmatprep.subr.bf16.mxu1 %v4157_v51 }
0x1739   :  { %3225 = vmatpush1.bf16.msra.mxu1 %v4161_v33 }
0x173a   :  { %3227 = vmatprep.subr.bf16.mxu1 %v4164_v35 }
0x173d   :  { %3229 = vmatpush1.bf16.msra.mxu1 %v4167_v38 }
0x173e   :  { %3231 = vmatprep.subr.bf16.mxu1 %v4171_v47 }
0x1741   :  { %3233 = vmatpush1.bf16.msra.mxu1 %v4173_v29 }
0x1742   :  { %3235 = vmatprep.subr.bf16.mxu1 %v4153_v24 }
0x1807   :  { %v1984_v14 = vpop.f32.mrb[4].mxu1 }
0x1808   :  { %v3366_v44 = vadd.f32 %v1984_v14, %v4197_v55  ;;  %v1986_v46 = vpop.f32.mrb[5].mxu1 }
0x1809   :  { %v3367_v22 = vadd.f32 %v1986_v46, %v4202_v60 }
0x180a   :  { %v2937_v16 = vmul.f32 -1.442695, %v3366_v44 }
0x180b   :  { %v2938_v52 = vmul.f32 -1.442695, %v3367_v22 }
0x180c   :  { %3577 = vpow2.f32 %v2937_v16 }
0x180d   :  { %3579 = vtanh.f32 %v3367_v22 }
0x1816   :  { %v3578_v23 = vpop.eup %3577 }
0x1817   :  { %v1994_v48 = vadd.f32 1.0, %v3578_v23  ;;  %v3580_v49 = vpop.eup %3579 }
0x1819   :  { %3581 = vrcp.f32 %v1994_v48 }
0x181a   :  { %3583 = vpow2.f32 %v2938_v52 }
0x1823   :  { %v3582_v30 = vpop.eup %3581 }
0x1824   :  { %v2005_v34 = vmul.f32 %v3582_v30, %v3580_v49  ;;  %v3584_v53 = vpop.eup %3583  ;;  %v2004_v56 = vmul.f32 %v3582_v30, %v1901_v36 }
0x1825   :  { %v2001_v54 = vadd.f32 1.0, %v3584_v53 }
0x1826   :  { %2007 = vrot.lane.b32.xlu0 %v2005_v34, %s3726_s4 }
0x1827   :  { %3585 = vrcp.f32 %v2001_v54 }
0x1831   :  { %v3586_v59 = vpop.eup %3585 }
0x1898   :  { %v2008_v57 = vpop.permute.xlu0 %2007 }
0x1899   :  { %v2010_v58 = vadd.f32 %v2008_v57, %v2004_v56 }
0x189b   :  { %3587 = vtanh.f32 %v2010_v58 }
0x18a5   :  { %v3588_v61 = vpop.eup %3587 }
0x18a6   :  { %v4240_v62 = vmul.f32 %v3588_v61, %v3586_v59 }
0x18a8   :  { %2023 = vrot.lane.b32.xlu1 %v4240_v62, %s3726_s4 }
0x191a   :  { %v2024_v63 = vpop.permute.xlu1 %2023 }
0x191b   :  { %2939 = vmatmul.mubr.msk.f32.vlgmr.msra.gmra.mrb[6].mxu1 %vm285_vm1, %v2024_v63 }
0x191c   :  { %3237 = vmatpush1.bf16.msra.mxu1 %v4155_v27  ;;  %2200 = vmatprep.mubr.f32.mxu1 %v3725_v0 }
0x191d   :  { %3239 = vmatprep.subr.bf16.mxu1 %v4157_v51 }
0x1920   :  { %3241 = vmatpush1.bf16.msra.mxu1 %v4161_v33 }
0x1921   :  { %3243 = vmatprep.subr.bf16.mxu1 %v4164_v35 }
0x1924   :  { %3245 = vmatpush1.bf16.msra.mxu1 %v4167_v38 }
0x1925   :  { %3247 = vmatprep.subr.bf16.mxu1 %v4171_v47 }
0x1928   :  { %3249 = vmatpush1.bf16.msra.mxu1 %v4173_v29 }
0x1929   :  { %3251 = vmatprep.subr.bf16.mxu1 %v4153_v24 }
0x19ee   :  { %v2093_v1 = vpop.f32.mrb[6].mxu1 }
0x19ef   :  { %v3368_v2 = vadd.f32 %v2093_v1, %v4197_v55  ;;  %v2095_v43 = vpop.f32.mrb[7].mxu1 }
0x19f0   :  { %v3369_v4 = vadd.f32 %v2095_v43, %v4202_v60 }
0x19f1   :  { %v2940_v3 = vmul.f32 -1.442695, %v3368_v2 }
0x19f2   :  { %v2941_v8 = vmul.f32 -1.442695, %v3369_v4 }
0x19f3   :  { %3589 = vpow2.f32 %v2940_v3 }
0x19f4   :  { %3591 = vtanh.f32 %v3369_v4 }
0x19fd   :  { %v3590_v5 = vpop.eup %3589 }
0x19fe   :  { %v2103_v6 = vadd.f32 1.0, %v3590_v5  ;;  %v3592_v7 = vpop.eup %3591 }
0x1a00   :  { %3593 = vrcp.f32 %v2103_v6 }
0x1a01   :  { %3595 = vpow2.f32 %v2941_v8 }
0x1a0a   :  { %v3594_v42 = vpop.eup %3593 }
0x1a0b   :  { %v2114_v50 = vmul.f32 %v3594_v42, %v3592_v7  ;;  %v3596_v10 = vpop.eup %3595  ;;  %v2113_v13 = vmul.f32 %v3594_v42, %v2010_v58 }
0x1a0c   :  { %v2110_v12 = vadd.f32 1.0, %v3596_v10 }
0x1a0d   :  { %2116 = vrot.lane.b32.xlu0 %v2114_v50, %s3726_s4 }
0x1a0e   :  { %3597 = vrcp.f32 %v2110_v12 }
0x1a18   :  { %v3598_v18 = vpop.eup %3597 }
0x1a7f   :  { %v2117_v15 = vpop.permute.xlu0 %2116 }
0x1a80   :  { %v2119_v17 = vadd.f32 %v2117_v15, %v2113_v13 }
0x1a82   :  { %3599 = vtanh.f32 %v2119_v17 }
0x1a8c   :  { %v3600_v19 = vpop.eup %3599 }
0x1a8d   :  { %v4257_v20 = vmul.f32 %v3600_v19, %v3598_v18 }
0x1a8f   :  { %2132 = vrot.lane.b32.xlu1 %v4257_v20, %s3726_s4 }
0x1b01   :  { %v2133_v21 = vpop.permute.xlu1 %2132 }
0x1b02   :  { %2942 = vmatmul.mubr.msk.f32.vlgmr.msra.gmra.mrb[8].mxu1 %vm285_vm1, %v2133_v21 }
0x1b03   :  { %3253 = vmatpush1.bf16.msra.mxu1 %v4155_v27  ;;  %2309 = vmatprep.mubr.f32.mxu1 %v3725_v0 }
0x1b04   :  { %3255 = vmatprep.subr.bf16.mxu1 %v4157_v51 }
0x1b07   :  { %3257 = vmatpush1.bf16.msra.mxu1 %v4161_v33 }
0x1b08   :  { %3259 = vmatprep.subr.bf16.mxu1 %v4164_v35 }
0x1b0b   :  { %3261 = vmatpush1.bf16.msra.mxu1 %v4167_v38 }
0x1b0c   :  { %3263 = vmatprep.subr.bf16.mxu1 %v4171_v47 }
0x1b0f   :  { %3265 = vmatpush1.bf16.msra.mxu1 %v4173_v29 }
0x1b10   :  { %3267 = vmatprep.subr.bf16.mxu1 %v4153_v24 }
0x1bd5   :  { %v2202_v45 = vpop.f32.mrb[8].mxu1 }
0x1bd6   :  { %v3370_v25 = vadd.f32 %v2202_v45, %v4197_v55  ;;  %v2204_v26 = vpop.f32.mrb[9].mxu1 }
0x1bd7   :  { %v3371_v31 = vadd.f32 %v2204_v26, %v4202_v60 }
0x1bd8   :  { %v2943_v28 = vmul.f32 -1.442695, %v3370_v25 }
0x1bd9   :  { %v2944_v41 = vmul.f32 -1.442695, %v3371_v31 }
0x1bda   :  { %3601 = vpow2.f32 %v2943_v28 }
0x1bdb   :  { %3603 = vtanh.f32 %v3371_v31 }
0x1be4   :  { %v3602_v11 = vpop.eup %3601 }
0x1be5   :  { %v2212_v32 = vadd.f32 1.0, %v3602_v11  ;;  %v3604_v36 = vpop.eup %3603 }
0x1be7   :  { %3605 = vrcp.f32 %v2212_v32 }
0x1be8   :  { %3607 = vpow2.f32 %v2944_v41 }
0x1bf1   :  { %v3606_v37 = vpop.eup %3605 }
0x1bf2   :  { %v2223_v39 = vmul.f32 %v3606_v37, %v3604_v36  ;;  %v3608_v14 = vpop.eup %3607  ;;  %v2222_v46 = vmul.f32 %v3606_v37, %v2119_v17 }
0x1bf3   :  { %v2219_v44 = vadd.f32 1.0, %v3608_v14 }
0x1bf4   :  { %2225 = vrot.lane.b32.xlu0 %v2223_v39, %s3726_s4 }
0x1bf5   :  { %3609 = vrcp.f32 %v2219_v44 }
0x1bff   :  { %v3610_v23 = vpop.eup %3609 }
0x1c66   :  { %v2226_v16 = vpop.permute.xlu0 %2225 }
0x1c67   :  { %v2228_v22 = vadd.f32 %v2226_v16, %v2222_v46 }
0x1c69   :  { %3611 = vtanh.f32 %v2228_v22 }
0x1c73   :  { %v3612_v48 = vpop.eup %3611 }
0x1c74   :  { %v4274_v49 = vmul.f32 %v3612_v48, %v3610_v23 }
0x1c76   :  { %2241 = vrot.lane.b32.xlu1 %v4274_v49, %s3726_s4 }
0x1ce8   :  { %v2242_v30 = vpop.permute.xlu1 %2241 }
0x1ce9   :  { %2945 = vmatmul.mubr.msk.f32.vlgmr.msra.gmra.mrb[10].mxu1 %vm285_vm1, %v2242_v30 }
0x1cea   :  { %3269 = vmatpush1.bf16.msra.mxu1 %v4155_v27  ;;  %2418 = vmatprep.mubr.f32.mxu1 %v3725_v0 }
0x1ceb   :  { %3271 = vmatprep.subr.bf16.mxu1 %v4157_v51 }
0x1cee   :  { %3273 = vmatpush1.bf16.msra.mxu1 %v4161_v33 }
0x1cef   :  { %3275 = vmatprep.subr.bf16.mxu1 %v4164_v35 }
0x1cf2   :  { %3277 = vmatpush1.bf16.msra.mxu1 %v4167_v38 }
0x1cf3   :  { %3279 = vmatprep.subr.bf16.mxu1 %v4171_v47 }
0x1cf6   :  { %3281 = vmatpush1.bf16.msra.mxu1 %v4173_v29 }
0x1cf7   :  { %3283 = vmatprep.subr.bf16.mxu1 %v4153_v24 }
0x1dbc   :  { %v2311_v34 = vpop.f32.mrb[10].mxu1 }
0x1dbd   :  { %v3372_v52 = vadd.f32 %v2311_v34, %v4197_v55  ;;  %v2313_v53 = vpop.f32.mrb[11].mxu1 }
0x1dbe   :  { %v3373_v56 = vadd.f32 %v2313_v53, %v4202_v60 }
0x1dbf   :  { %v2946_v54 = vmul.f32 -1.442695, %v3372_v52 }
0x1dc0   :  { %v2947_v1 = vmul.f32 -1.442695, %v3373_v56 }
0x1dc1   :  { %3613 = vpow2.f32 %v2946_v54 }
0x1dc2   :  { %3615 = vtanh.f32 %v3373_v56 }
0x1dcb   :  { %v3614_v57 = vpop.eup %3613 }
0x1dcc   :  { %v2321_v58 = vadd.f32 1.0, %v3614_v57  ;;  %v3616_v59 = vpop.eup %3615 }
0x1dce   :  { %3617 = vrcp.f32 %v2321_v58 }
0x1dcf   :  { %3619 = vpow2.f32 %v2947_v1 }
0x1dd8   :  { %v3618_v61 = vpop.eup %3617 }
0x1dd9   :  { %v2332_v63 = vmul.f32 %v3618_v61, %v3616_v59  ;;  %v3620_v2 = vpop.eup %3619  ;;  %v2331_v3 = vmul.f32 %v3618_v61, %v2228_v22 }
0x1dda   :  { %v2328_v43 = vadd.f32 1.0, %v3620_v2  ;;  %v3727_v2 = vmov 0  }
0x1ddb   :  { %2334 = vrot.lane.b32.xlu0 %v2332_v63, %s3726_s4  ;;  %3432 = vset.pattern.permute.xlu1 %v3727_v2 }
0x1ddc   :  { %3621 = vrcp.f32 %v2328_v43  ;;  %3431 = vset.pattern.permute.xlu0 %v3727_v2 }
0x1de6   :  { %v3622_v6 = vpop.eup %3621 }
0x1e4d   :  { %v2335_v4 = vpop.permute.xlu0 %2334 }
0x1e4e   :  { %v2337_v5 = vadd.f32 %v2335_v4, %v2331_v3 }
0x1e50   :  { %3623 = vtanh.f32 %v2337_v5 }
0x1e5a   :  { %v3624_v7 = vpop.eup %3623 }
0x1e5b   :  { %v4291_v42 = vmul.f32 %v3624_v7, %v3622_v6 }
0x1e5d   :  { %2350 = vrot.lane.b32.xlu1 %v4291_v42, %s3726_s4 }
0x1ecf   :  { %v2351_v50 = vpop.permute.xlu1 %2350 }
0x1ed0   :  { %2948 = vmatmul.mubr.msk.f32.vlgmr.msra.gmra.mrb[12].mxu1 %vm285_vm1, %v2351_v50 }
0x1ed1   :  { %3285 = vmatpush1.bf16.msra.mxu1 %v4155_v27  ;;  %2527 = vmatprep.mubr.f32.mxu1 %v3725_v0 }
0x1ed2   :  { %3287 = vmatprep.subr.bf16.mxu1 %v4157_v51 }
0x1ed5   :  { %3289 = vmatpush1.bf16.msra.mxu1 %v4161_v33 }
0x1ed6   :  { %3291 = vmatprep.subr.bf16.mxu1 %v4164_v35 }
0x1ed9   :  { %3293 = vmatpush1.bf16.msra.mxu1 %v4167_v38 }
0x1eda   :  { %3295 = vmatprep.subr.bf16.mxu1 %v4171_v47 }
0x1edd   :  { %3297 = vmatpush1.bf16.msra.mxu1 %v4173_v29 }
0x1ede   :  { %3299 = vmatprep.subr.bf16.mxu1 %v4153_v24 }
0x1fa3   :  { %v2420_v8 = vpop.f32.mrb[12].mxu1 }
0x1fa4   :  { %v3374_v10 = vadd.f32 %v2420_v8, %v4197_v55  ;;  %v2422_v12 = vpop.f32.mrb[13].mxu1 }
0x1fa5   :  { %v3375_v15 = vadd.f32 %v2422_v12, %v4202_v60 }
0x1fa6   :  { %v2949_v13 = vmul.f32 -1.442695, %v3374_v10 }
0x1fa7   :  { %v2950_v25 = vmul.f32 -1.442695, %v3375_v15 }
0x1fa8   :  { %3625 = vpow2.f32 %v2949_v13 }
0x1fa9   :  { %3627 = vtanh.f32 %v3375_v15 }
0x1fb2   :  { %v3626_v17 = vpop.eup %3625 }
0x1fb3   :  { %v2430_v18 = vadd.f32 1.0, %v3626_v17  ;;  %v3628_v19 = vpop.eup %3627 }
0x1fb5   :  { %3629 = vrcp.f32 %v2430_v18 }
0x1fb6   :  { %3631 = vpow2.f32 %v2950_v25 }
0x1fbf   :  { %v3630_v21 = vpop.eup %3629 }
0x1fc0   :  { %v2441_v45 = vmul.f32 %v3630_v21, %v3628_v19  ;;  %v3632_v26 = vpop.eup %3631  ;;  %v2440_v31 = vmul.f32 %v3630_v21, %v2337_v5 }
0x1fc1   :  { %v2437_v28 = vadd.f32 1.0, %v3632_v26 }
0x1fc2   :  { %2443 = vrot.lane.b32.xlu0 %v2441_v45, %s3726_s4 }
0x1fc3   :  { %3633 = vrcp.f32 %v2437_v28 }
0x1fcd   :  { %v3634_v36 = vpop.eup %3633 }
0x2034   :  { %v2444_v11 = vpop.permute.xlu0 %2443 }
0x2035   :  { %v2446_v32 = vadd.f32 %v2444_v11, %v2440_v31 }
0x2037   :  { %3635 = vtanh.f32 %v2446_v32 }
0x2041   :  { %v3636_v37 = vpop.eup %3635 }
0x2042   :  { %v4308_v39 = vmul.f32 %v3636_v37, %v3634_v36 }
0x2044   :  { %2459 = vrot.lane.b32.xlu1 %v4308_v39, %s3726_s4 }
0x20b6   :  { %v2460_v41 = vpop.permute.xlu1 %2459 }
0x20b7   :  { %2951 = vmatmul.mubr.msk.f32.vlgmr.msra.gmra.mrb[14].mxu1 %vm285_vm1, %v2460_v41 }
0x20b8   :  { %3301 = vmatpush1.bf16.msra.mxu1 %v4155_v27  ;;  %2636 = vmatprep.mubr.f32.mxu1 %v3725_v0 }
0x20b9   :  { %3303 = vmatprep.subr.bf16.mxu1 %v4157_v51 }
0x20bc   :  { %3305 = vmatpush1.bf16.msra.mxu1 %v4161_v33 }
0x20bd   :  { %3307 = vmatprep.subr.bf16.mxu1 %v4164_v35 }
0x20c0   :  { %3309 = vmatpush1.bf16.msra.mxu1 %v4167_v38 }
0x20c1   :  { %3311 = vmatprep.subr.bf16.mxu1 %v4171_v47 }
0x20c4   :  { %3313 = vmatpush1.bf16.msra.mxu1 %v4173_v29 }
0x20c5   :  { %3315 = vmatprep.subr.bf16.mxu1 %v4153_v24 }
0x218a   :  { %v2529_v14 = vpop.f32.mrb[14].mxu1 }
0x218b   :  { %v3376_v44 = vadd.f32 %v2529_v14, %v4197_v55  ;;  %v2531_v46 = vpop.f32.mrb[15].mxu1 }
0x218c   :  { %v3377_v22 = vadd.f32 %v2531_v46, %v4202_v60 }
0x218d   :  { %v2952_v16 = vmul.f32 -1.442695, %v3376_v44 }
0x218e   :  { %v2953_v53 = vmul.f32 -1.442695, %v3377_v22 }
0x218f   :  { %3637 = vpow2.f32 %v2952_v16 }
0x2190   :  { %3639 = vtanh.f32 %v3377_v22 }
0x2199   :  { %v3638_v23 = vpop.eup %3637 }
0x219a   :  { %v2539_v48 = vadd.f32 1.0, %v3638_v23  ;;  %v3640_v30 = vpop.eup %3639 }
0x219c   :  { %3641 = vrcp.f32 %v2539_v48 }
0x219d   :  { %3643 = vpow2.f32 %v2953_v53  ;;  %v3728_v53 = vmov 0.0|0.0  }
0x219e   :  { %3330 = vmatprep.subr.bf16.mxu0 %v3728_v53 }
0x21a6   :  { %v3642_v34 = vpop.eup %3641 }
0x21a7   :  { %v2550_v52 = vmul.f32 %v3642_v34, %v3640_v30  ;;  %v3644_v24 = vpop.eup %3643  ;;  %v2549_v56 = vmul.f32 %v3642_v34, %v2446_v32  ;;  %v2784_v34 = vld [vmem:[%s4430_s8 + $0x8] sm:$0xff] }
0x21a8   :  { %v2546_v54 = vadd.f32 1.0, %v3644_v24 }
0x21a9   :  { %2552 = vrot.lane.b32.xlu0 %v2550_v52, %s3726_s4  ;;  %v2785_v52 = vld [vmem:[%s4430_s8 + $0x10] sm:$0xff] }
0x21aa   :  { %3645 = vrcp.f32 %v2546_v54  ;;  %v2786_v54 = vld [vmem:[%s4430_s8 + $0x18] sm:$0xff] }
0x21b4   :  { %v3646_v59 = vpop.eup %3645 }
0x221b   :  { %v2553_v57 = vpop.permute.xlu0 %2552 }
0x221c   :  { %v2555_v58 = vadd.f32 %v2553_v57, %v2549_v56  ;;  %v3334_v56 = vpack.c.bf16 %v2786_v54, %v2785_v52  ;;  %v2787_v57 = vld [vmem:[%s4430_s8 + $0x20] sm:$0xff] }
0x221e   :  { %3647 = vtanh.f32 %v2555_v58 }
0x2228   :  { %v3648_v61 = vpop.eup %3647 }
0x2229   :  { %v4325_v63 = vmul.f32 %v3648_v61, %v3646_v59  ;;  %v2789_v61 = vld [vmem:[%s4430_s8 + $0x30] sm:$0xff] }
0x222b   :  { %2568 = vrot.lane.b32.xlu1 %v4325_v63, %s3726_s4 }
0x229d   :  { %v2569_v1 = vpop.permute.xlu1 %2568 }
0x229e   :  { %2954 = vmatmul.mubr.msk.f32.vlgmr.msra.gmra.mrb[16].mxu1 %vm285_vm1, %v2569_v1 }
0x229f   :  { %3317 = vmatpush1.bf16.msra.mxu1 %v4155_v27  ;;  %2745 = vmatprep.mubr.f32.mxu1 %v3725_v0  ;;  %v2790_v0 = vld [vmem:[%s4430_s8 + $0x38] sm:$0xff] }
0x22a0   :  { %3319 = vmatprep.subr.bf16.mxu1 %v4157_v51  ;;  %v3340_v1 = vpack.c.bf16 %v2790_v0, %v2789_v61 }
0x22a3   :  { %3321 = vmatpush1.bf16.msra.mxu1 %v4161_v33 }
0x22a4   :  { %3323 = vmatprep.subr.bf16.mxu1 %v4164_v35 }
0x22a7   :  { %3325 = vmatpush1.bf16.msra.mxu1 %v4167_v38  ;;  %v63_v38 = vld [vmem:[%s4423_s1] sm:$0xff] }
0x22a8   :  { %3327 = vmatprep.subr.bf16.mxu1 %v4171_v47  ;;  %v4345_v47 = vadd.s32 4294967295, %v63_v38 }
0x22aa   :  { %vm1795_vm2 = vcmp.eq.s32.totalorder %v4345_v47, 0  ;;  %vm2231_vm3 = vcmp.eq.s32.totalorder %v4345_v47, 4  ;;  %vm1904_vm4 = vcmp.eq.s32.totalorder %v4345_v47, 1  ;;  %vm2013_vm5 = vcmp.eq.s32.totalorder %v4345_v47, 2 }
0x22ab   :  { %3329 = vmatpush1.bf16.msra.mxu1 %v4173_v29  ;;  %v1796_v7 = vsel %vm1795_vm2, 1, %v3727_v2  ;;  %v2232_v50 = vsel %vm2231_vm3, 1, %v3727_v2  ;;  %v1905_v45 = vsel %vm1904_vm4, 1, %v3727_v2  ;;  %v2014_v25 = vsel %vm2013_vm5, 1, %v3727_v2 }
0x22ac   :  { %vm2122_vm6 = vcmp.eq.s32.totalorder %v4345_v47, 3  ;;  %vm2340_vm7 = vcmp.eq.s32.totalorder %v4345_v47, 5  ;;  %vm2558_vm8 = vcmp.eq.s32.totalorder %v4345_v47, 7  ;;  %vm2776_vm9 = vcmp.eq.s32.totalorder %v4345_v47, 9 }
0x22ad   :  { %v2123_v26 = vsel %vm2122_vm6, 1, %v3727_v2  ;;  %v2341_v28 = vsel %vm2340_vm7, 1, %v3727_v2  ;;  %v2559_v11 = vsel %vm2558_vm8, 1, %v3727_v2  ;;  %v2777_v32 = vsel %vm2776_vm9, 1, %v3727_v2 }
0x22ae   :  { %vm2449_vm10 = vcmp.eq.s32.totalorder %v4345_v47, 6  ;;  %vm2667_vm11 = vcmp.eq.s32.totalorder %v4345_v47, 8  ;;  %vm2873_vm8 = vcmask 39936  }
0x22af   :  { %v2450_v30 = vsel %vm2449_vm10, 1, %v3727_v2 }
0x2371   :  { %v2638_v27 = vpop.f32.mrb[16].mxu1 }
0x2372   :  { %v3378_v43 = vadd.f32 %v2638_v27, %v4197_v55  ;;  %v2640_v3 = vpop.f32.mrb[17].mxu1 }
0x2373   :  { %v3379_v33 = vadd.f32 %v2640_v3, %v4202_v60 }
0x2374   :  { %v2955_v51 = vmul.f32 -1.442695, %v3378_v43 }
0x2375   :  { %v2956_v8 = vmul.f32 -1.442695, %v3379_v33 }
0x2376   :  { %3649 = vpow2.f32 %v2955_v51 }
0x2377   :  { %3651 = vtanh.f32 %v3379_v33 }
0x2380   :  { %v3650_v35 = vpop.eup %3649 }
0x2381   :  { %v2648_v4 = vadd.f32 1.0, %v3650_v35  ;;  %v3652_v29 = vpop.eup %3651 }
0x2383   :  { %3653 = vrcp.f32 %v2648_v4 }
0x2384   :  { %3655 = vpow2.f32 %v2956_v8 }
0x238d   :  { %v3654_v5 = vpop.eup %3653 }
0x238e   :  { %v2659_v6 = vmul.f32 %v3654_v5, %v3652_v29  ;;  %v3656_v10 = vpop.eup %3655  ;;  %v2658_v13 = vmul.f32 %v3654_v5, %v2555_v58  ;;  %v2788_v58 = vld [vmem:[%s4430_s8 + $0x28] sm:$0xff] }
0x238f   :  { %v2655_v12 = vadd.f32 1.0, %v3656_v10  ;;  %v3337_v59 = vpack.c.bf16 %v2788_v58, %v2787_v57 }
0x2390   :  { %2661 = vrot.lane.b32.xlu0 %v2659_v6, %s3726_s4 }
0x2391   :  { %3657 = vrcp.f32 %v2655_v12 }
0x2394   :  { %1798 = vperm.xlu0 %3431, %v1796_v7  }
0x2398   :  { %2234 = vperm.xlu0 %3431, %v2232_v50  }
0x239b   :  { %v3658_v18 = vpop.eup %3657 }
0x2402   :  { %v2662_v15 = vpop.permute.xlu0 %2661 }
0x2403   :  { %v4352_v17 = vadd.f32 %v2662_v15, %v2658_v13 }
0x2405   :  { %3659 = vtanh.f32 %v4352_v17 }
0x240f   :  { %v3660_v19 = vpop.eup %3659 }
0x2410   :  { %v4355_v21 = vmul.f32 %v3660_v19, %v3658_v18 }
0x2412   :  { %2677 = vrot.lane.b32.xlu1 %v4355_v21, %s3726_s4 }
0x2413   :  { %v1799_v27 = vpop.permute.xlu0 %1798 }
0x2414   :  { %vm1800_vm13 = vcmp.eq.s32.totalorder %v1799_v27, 1 }
0x2415   :  { %v1801_v6 = vsel %vm1800_vm13, %v4206_v9, 0.0 }
0x2416   :  { %1907 = vperm.xlu1 %3432, %v1905_v45  }
0x2417   :  { %v2235_v51 = vpop.permute.xlu0 %2234 }
0x2418   :  { %vm2236_vm2 = vcmp.eq.s32.totalorder %v2235_v51, 1 }
0x241a   :  { %2016 = vperm.xlu1 %3432, %v2014_v25  }
0x241e   :  { %2125 = vperm.xlu1 %3432, %v2123_v26  }
0x2422   :  { %2343 = vperm.xlu1 %3432, %v2341_v28  }
0x2426   :  { %2561 = vperm.xlu1 %3432, %v2559_v11  }
0x242a   :  { %2779 = vperm.xlu1 %3432, %v2777_v32  }
0x2484   :  { %v2678_v31 = vpop.permute.xlu1 %2677 }
0x2485   :  { %2957 = vmatmul.mubr.msk.f32.vlgmr.msra.gmra.mrb[18].mxu1 %vm285_vm1, %v2678_v31 }
0x2495   :  { %v1908_v43 = vpop.permute.xlu1 %1907 }
0x2496   :  { %vm1909_vm14 = vcmp.eq.s32.totalorder %v1908_v43, 1 }
0x2497   :  { %v1910_v50 = vsel %vm1909_vm14, %v4223_v40, %v1801_v6 }
0x2499   :  { %v2017_v33 = vpop.permute.xlu1 %2016 }
0x249a   :  { %vm2018_vm15 = vcmp.eq.s32.totalorder %v2017_v33, 1 }
0x249b   :  { %v2019_v10 = vsel %vm2018_vm15, %v4240_v62, %v1910_v50 }
0x249d   :  { %v2126_v29 = vpop.permute.xlu1 %2125 }
0x249e   :  { %vm2127_vm0 = vcmp.eq.s32.totalorder %v2126_v29, 1 }
0x249f   :  { %v2128_v12 = vsel %vm2127_vm0, %v4257_v20, %v2019_v10 }
0x24a1   :  { %v2344_v5 = vpop.permute.xlu1 %2343 }
0x24a2   :  { %vm2345_vm3 = vcmp.eq.s32.totalorder %v2344_v5, 1 }
0x24a5   :  { %v2562_v13 = vpop.permute.xlu1 %2561 }
0x24a6   :  { %vm2563_vm5 = vcmp.eq.s32.totalorder %v2562_v13, 1 }
0x24a9   :  { %v2780_v45 = vpop.permute.xlu1 %2779 }
0x24aa   :  { %vm2781_vm7 = vcmp.eq.s32.totalorder %v2780_v45, 1 }
0x2558   :  { %v2747_v36 = vpop.f32.mrb[18].mxu1 }
0x2559   :  { %v3380_v37 = vadd.f32 %v2747_v36, %v4197_v55  ;;  %v2749_v41 = vpop.f32.mrb[19].mxu1  ;;  %v2668_v55 = vsel %vm2667_vm11, 1, %v3727_v2 }
0x255a   :  { %v3381_v44 = vadd.f32 %v2749_v41, %v4202_v60  ;;  %v2783_v60 = vld [vmem:[%s4430_s8] sm:$0xff] }
0x255b   :  { %v2958_v14 = vmul.f32 -1.442695, %v3380_v37  ;;  %v3331_v24 = vpack.c.bf16 %v2784_v34, %v2783_v60 }
0x255c   :  { %v2959_v2 = vmul.f32 -1.442695, %v3381_v44 }
0x255d   :  { %3661 = vpow2.f32 %v2958_v14  ;;  %3332 = vmatpush3.bf16.msra.mxu0 %v3331_v24 }
0x255e   :  { %3663 = vtanh.f32 %v3381_v44  ;;  %3333 = vmatprep.subr.bf16.mxu0 %v3728_v53 }
0x2561   :  { %3335 = vmatpush3.bf16.msra.mxu0 %v3334_v56 }
0x2562   :  { %3336 = vmatprep.subr.bf16.mxu0 %v3728_v53 }
0x2565   :  { %3338 = vmatpush3.bf16.msra.mxu0 %v3337_v59 }
0x2566   :  { %3339 = vmatprep.subr.bf16.mxu0 %v3728_v53 }
0x2567   :  { %v3662_v46 = vpop.eup %3661 }
0x2568   :  { %v2757_v16 = vadd.f32 1.0, %v3662_v46  ;;  %v3664_v22 = vpop.eup %3663 }
0x2569   :  { %3341 = vmatpush3.bf16.msra.mxu0 %v3340_v1 }
0x256a   :  { %3665 = vrcp.f32 %v2757_v16 }
0x256b   :  { %3667 = vpow2.f32 %v2959_v2 }
0x2574   :  { %v3666_v23 = vpop.eup %3665 }
0x2575   :  { %v2768_v48 = vmul.f32 %v3666_v23, %v3664_v22  ;;  %v3668_v3 = vpop.eup %3667  ;;  %v2767_v4 = vmul.f32 %v3666_v23, %v4352_v17  ;;  %v2237_v17 = vsel %vm2236_vm2, %v4274_v49, %v2128_v12  ;;  %v2960_v49 = vld [vmem:[%s4431_s9] ss:$0 sm:$0xff] }
0x2576   :  { %v2764_v35 = vadd.f32 1.0, %v3668_v3  ;;  %v2346_v19 = vsel %vm2345_vm3, %v4291_v42, %v2237_v17 }
0x2577   :  { %2770 = vrot.lane.b32.xlu0 %v2768_v48, %s3726_s4 }
0x2578   :  { %3669 = vrcp.f32 %v2764_v35 }
0x257b   :  { %2452 = vperm.xlu0 %3431, %v2450_v30  }
0x257f   :  { %2670 = vperm.xlu0 %3431, %v2668_v55  }
0x2582   :  { %v3670_v7 = vpop.eup %3669 }
0x25e9   :  { %v2771_v38 = vpop.permute.xlu0 %2770 }
0x25ea   :  { %v2773_v47 = vadd.f32 %v2771_v38, %v2767_v4 }
0x25ec   :  { %3671 = vtanh.f32 %v2773_v47 }
0x25f6   :  { %v3672_v8 = vpop.eup %3671 }
0x25f7   :  { %v2775_v15 = vmul.f32 %v3672_v8, %v3670_v7 }
0x25fa   :  { %v2453_v18 = vpop.permute.xlu0 %2452 }
0x25fb   :  { %vm2454_vm4 = vcmp.eq.s32.totalorder %v2453_v18, 1 }
0x25fc   :  { %v2455_v9 = vsel %vm2454_vm4, %v4308_v39, %v2346_v19 }
0x25fd   :  { %v2564_v25 = vsel %vm2563_vm5, %v4325_v63, %v2455_v9 }
0x25fe   :  { %v2671_v40 = vpop.permute.xlu0 %2670 }
0x25ff   :  { %vm2672_vm6 = vcmp.eq.s32.totalorder %v2671_v40, 1 }
0x2600   :  { %v2673_v62 = vsel %vm2672_vm6, %v4355_v21, %v2564_v25 }
0x2601   :  { %v2782_v20 = vsel %vm2781_vm7, %v2775_v15, %v2673_v62 }
0x2602   :  { %2799 = vrot.lane.b32.xlu0 %v2782_v20, %s3726_s4 }
0x2674   :  { %v2800_v26 = vpop.permute.xlu0 %2799 }
0x2675   :  { %2988 = vmatmul.mubr.msk.f32.vlgmr.msra.gmra.mrb[20].mxu0 %vm285_vm1, %v2800_v26 }
0x2748   :  { %v2869_v42 = vpop.f32.mrb[20].mxu0 }
0x2749   :  { %v2870_v39 = vadd.f32 %v2960_v49, %v2869_v42  ;;  %v2989_v28 = vpop.f32.mrb[21].mxu0 }
0x274b   :  { %2874 = vst.msk [vmem:[%s4432_s10] sm:$0xff] %vm2873_vm8, %v2870_v39 }
0x274c   :  { %2879 = vsyncpa [#allocation5], 1 }
0x274d   :  { %2880 = vsyncpa [#allocation7], 1 }

</bundles_post_ra>
